<compile_context>
chip_gen: v7x
topology: tpu7x:2x2x1
jax: 0.10.0
libtpu: 0.0.40
codegen_flags: <defaults>
</compile_context>

<pallas_src>
import functools

import jax
import jax.numpy as jnp
from jax import lax
from jax.experimental import pallas as pl
from jax.experimental.pallas import tpu as pltpu

SMOOTH = 1e-05
_LANES = 128
_SUBLANES = 8
_ROW_ALIGN = 32                        # keeps int8 target blocks tile-aligned
_MAX_TILE_ROWS = 512                   # upper bound on spatial rows per grid step
_LOGITS_TILE_BUDGET = 4 * 1024 * 1024  # per-buffer logits bytes target
_VMEM_LIMIT = 32 * 1024 * 1024


def _round_up(x, m):
    return (x + m - 1) // m * m


def _soft_dice_partial_kernel(logits_ref, tgt_ref, out_ref):
    """One (batch, spatial-tile) grid step.

    logits_ref: (1, C, TR, 128)    bf16 or f32 logits
    tgt_ref:    (1, TR, 128)       int8/int32 class ids, -1 marks spatial padding
    out_ref:    (1, 2*C, 8, 128)   f32 partials, resident across the tile axis
                                   (index 0..C-1 = sum_p, C..2C-1 = inter)
    """
    C = logits_ref.shape[1]
    tile_rows = logits_ref.shape[2]
    n_strips = tile_rows // _SUBLANES

    # Output block index is constant along the trailing "arbitrary" tile axis,
    # so it stays resident in VMEM and is written back to HBM once per batch.
    @pl.when(pl.program_id(1) == 0)
    def _():
        out_ref[...] = jnp.zeros_like(out_ref)

    def _strip(r0):
        # --- one (8, 128) sublane strip; everything below lives in vregs ---
        t = tgt_ref[0, pl.ds(r0, _SUBLANES), :].astype(jnp.int32)
        valid = t >= 0

        # Pass 1: class max as a C-way elementwise max in the *native* dtype
        # (bf16 max is exact; v6e/v7x VALUs handle bf16 natively), then one
        # upcast of m to f32.
        m = logits_ref[0, 0, pl.ds(r0, _SUBLANES), :]
        for c in range(1, C):
            m = jnp.maximum(m, logits_ref[0, c, pl.ds(r0, _SUBLANES), :])
        m = m.astype(jnp.float32)

        # Pass 2: exp (EUP) + denominator.  e_c stay in vregs -> no
        # (C, TR, 128) VMEM scratch, no extra vld/vst in the hot loop.
        # TODO(synk): for C >> 32 switch to a (C, 8, 128) per-strip scratch +
        # lax.fori_loop over classes to avoid vreg spills / code blow-up.
        es = []
        z = jnp.zeros((_SUBLANES, _LANES), jnp.float32)
        for c in range(C):
            e_c = jnp.exp(
                logits_ref[0, c, pl.ds(r0, _SUBLANES), :].astype(jnp.float32) - m)
            es.append(e_c)
            z = z + e_c

        # One exact reciprocal per position, fused with the padding mask so
        # padded columns drop out of every sum (exact divide for 1e-5 parity).
        r = jnp.where(valid, 1.0 / z, 0.0)

        # Pass 3: per-class partials accumulated straight into the resident
        # output block.  No one-hot materialization; sum_t is recovered in the
        # cheap JAX epilogue from the raw integer target.
        for c in range(C):
            p_c = es[c] * r
            out_ref[0, c, :, :] += p_c
            out_ref[0, C + c, :, :] += jnp.where(t == c, p_c, 0.0)

    if n_strips <= 4:
        # Short tiles: fully static unroll (max LLO visibility).
        for i in range(n_strips):
            _strip(i * _SUBLANES)
    else:
        # Longer tiles: bounded-unroll fori_loop keeps code size sane.
        def body(i, carry):
            _strip(pl.multiple_of(i * _SUBLANES, _SUBLANES))
            return carry
        lax.fori_loop(0, n_strips, body, 0, unroll=4)


@functools.partial(jax.jit, static_argnums=(2, 3))
def soft_dice_loss(logits, target, n_classes, max_tile_rows=_MAX_TILE_ROWS):
    """logits: (B, C, H, W); target: (B, H, W) integer class ids."""
    B, C, H, W = logits.shape
    assert C == n_classes
    S = H * W

    # Keep bf16 logits as bf16 in HBM (memory-bound -> ~2x less logits traffic);
    # everything else streams as f32 / int8.  Upcast happens in-kernel.
    in_dtype = jnp.bfloat16 if logits.dtype == jnp.bfloat16 else jnp.float32
    itemsize = jnp.dtype(in_dtype).itemsize

    rows = -(-S // _LANES)
    rows_aligned = _round_up(rows, _ROW_ALIGN)

    # Spatial tile: as large as fits a ~4 MiB per-buffer logits budget.  With
    # the strip-granular body the only per-tile VMEM is the (double-buffered)
    # streamed inputs + a small resident output block, so the working set stays
    # well under v5e/v6e default scoped VMEM and v7x's 32 MiB default / 64 MiB
    # physical for any tile_rows.
    budget_rows = _LOGITS_TILE_BUDGET // (C * _LANES * itemsize)
    budget_rows = max(_ROW_ALIGN, (budget_rows // _ROW_ALIGN) * _ROW_ALIGN)
    tile_rows = max(_ROW_ALIGN, min(max_tile_rows, budget_rows, rows_aligned))
    rows_padded = _round_up(rows_aligned, tile_rows)
    n_tiles = rows_padded // tile_rows
    s_pad = rows_padded * _LANES

    x = logits.reshape(B, C, S).astype(in_dtype)
    if s_pad != S:
        x = jnp.pad(x, ((0, 0), (0, 0), (0, s_pad - S)))
    x = x.reshape(B, C, rows_padded, _LANES)

    # Dense mask: int8 when C < 128 (-1 marks spatial padding, never matches).
    tgt_dtype = jnp.int8 if n_classes < 128 else jnp.int32
    t = target.reshape(B, S).astype(jnp.int32)
    if s_pad != S:
        t = jnp.pad(t, ((0, 0), (0, s_pad - S)), constant_values=-1)
    t = t.astype(tgt_dtype).reshape(B, rows_padded, _LANES)

    cost = pl.CostEstimate(
        flops=10 * B * C * s_pad,
        transcendentals=B * C * s_pad,
        bytes_accessed=(x.size * itemsize
                        + t.size * jnp.dtype(tgt_dtype).itemsize
                        + B * 2 * C * _SUBLANES * _LANES * 4),
    )

    partials = pl.pallas_call(
        _soft_dice_partial_kernel,
        out_shape=jax.ShapeDtypeStruct((B, 2 * C, _SUBLANES, _LANES), jnp.float32),
        grid_spec=pltpu.PrefetchScalarGridSpec(
            num_scalar_prefetch=0,
            grid=(B, n_tiles),
            in_specs=[
                pl.BlockSpec((1, C, tile_rows, _LANES), lambda b, s: (b, 0, s, 0)),
                pl.BlockSpec((1, tile_rows, _LANES), lambda b, s: (b, s, 0)),
            ],
            out_specs=pl.BlockSpec((1, 2 * C, _SUBLANES, _LANES),
                                   lambda b, s: (b, 0, 0, 0)),
        ),
        compiler_params=pltpu.CompilerParams(
            # Batch axis "parallel" (megacore); spatial-tile axis must be
            # "arbitrary" so the output block accumulates across it.
            # Note(v7x, B=1): add a leading size-2 parallel split of the tile
            # axis to keep both TensorCores busy.
            dimension_semantics=("parallel", "arbitrary"),
            vmem_limit_bytes=_VMEM_LIMIT,
        ),
        cost_estimate=cost,
    )(x, t)

    # Tiny JAX epilogue: fold lane/sublane partials; per-class target counts
    # (sum_t) come straight from the UNPADDED integer target so padding never
    # leaks in; then dice = 2*inter/(sum_p+sum_t+smooth) and the scalar loss.
    sums = jnp.sum(partials, axis=(2, 3))            # (B, 2C)
    sum_p = sums[:, :C]
    inter = sums[:, C:]
    classes = jnp.arange(C, dtype=jnp.int32)
    sum_t = jnp.sum(
        (target.reshape(B, 1, S).astype(jnp.int32) == classes[None, :, None]
         ).astype(jnp.float32),
        axis=-1)                                     # (B, C)
    dice = 2.0 * inter / (sum_p + sum_t + SMOOTH)
    return 1.0 - jnp.sum(dice) / (float(B) * float(C))


def _soft_dice_loss_ref(logits, target, n_classes):
    """Pure-JAX reference matching the PyTorch module semantics."""
    B, C, H, W = logits.shape
    p = jax.nn.softmax(logits.astype(jnp.float32), axis=1).reshape(B, C, -1)
    onehot = jax.nn.one_hot(target.reshape(B, -1), C, dtype=jnp.float32)
    onehot = jnp.transpose(onehot, (0, 2, 1))        # (B, C, S)
    inter = jnp.sum(p * onehot, axis=2)
    union = jnp.sum(p, axis=2) + jnp.sum(onehot, axis=2) + SMOOTH
    score = jnp.sum(2.0 * inter / union)
    return 1.0 - score / (float(B) * float(C))


if __name__ == "__main__":
    key = jax.random.PRNGKey(0)
    k1, k2, k3, k4 = jax.random.split(key, 4)

    # Small case from the module spec: B=2, C=4, 16x16 spatial.
    B, C, H, W = 2, 4, 16, 16
    logits = jax.random.normal(k1, (B, C, H, W), dtype=jnp.float32)
    target = jax.random.randint(k2, (B, H, W), 0, C, dtype=jnp.int32)
    loss = jax.block_until_ready(soft_dice_loss(logits, target, C))
    ref = _soft_dice_loss_ref(logits, target, C)
    assert jnp.allclose(loss, ref, rtol=1e-5, atol=1e-5), (loss, ref)

    # bf16-logits streaming path (in-kernel math stays f32 -> parity holds).
    logits_bf16 = logits.astype(jnp.bfloat16)
    loss_bf16 = jax.block_until_ready(soft_dice_loss(logits_bf16, target, C))
    ref_bf16 = _soft_dice_loss_ref(logits_bf16.astype(jnp.float32), target, C)
    assert jnp.allclose(loss_bf16, ref_bf16, rtol=1e-5, atol=1e-5), (loss_bf16, ref_bf16)

    # Multi-tile accumulation + spatial padding + fori_loop strip path.
    B2, C2, H2, W2 = 1, 6, 130, 100
    logits2 = jax.random.normal(k3, (B2, C2, H2, W2), dtype=jnp.float32)
    target2 = jax.random.randint(k4, (B2, H2, W2), 0, C2, dtype=jnp.int32)
    loss2 = jax.block_until_ready(soft_dice_loss(logits2, target2, C2, 64))
    ref2 = _soft_dice_loss_ref(logits2, target2, C2)
    assert jnp.allclose(loss2, ref2, rtol=1e-5, atol=1e-5), (loss2, ref2)

    print("KERNEL_OK")
</pallas_src>

<mosaic_0001>
module attributes {stable_mosaic.version = 11 : i64} {
  func.func @_soft_dice_partial_kernel(%arg0: i32, %arg1: i32, %arg2: memref<1x4x32x128xf32, #tpu.memory_space<vmem>>, %arg3: memref<1x32x128xi8, #tpu.memory_space<vmem>>, %arg4: memref<1x8x8x128xf32, #tpu.memory_space<vmem>>) attributes {dimension_semantics = [#tpu.dimension_semantics<parallel>, #tpu.dimension_semantics<arbitrary>], iteration_bounds = array<i64: 2, 1>, scalar_prefetch = 0 : i64, scratch_operands = 0 : i64, tpu.core_type = #tpu.core_type<tc>, window_params = [{transform_indices = @transform_0, window_bounds = array<i64: 1, 4, 32, 128>}, {transform_indices = @transform_1, window_bounds = array<i64: 1, 32, 128>}, {transform_indices = @transform_2, window_bounds = array<i64: 1, 8, 8, 128>}]} {
    %c0_i32 = arith.constant 0 : i32
    %0 = arith.cmpi eq, %arg1, %c0_i32 : i32
    %1 = arith.extui %0 : i1 to i32
    %c0_i32_0 = arith.constant 0 : i32
    %2 = arith.cmpi ne, %1, %c0_i32_0 : i32
    scf.if %2 {
      %cst_430 = arith.constant 0.000000e+00 : f32
      %439 = vector.broadcast %cst_430 : f32 to vector<1x8x8x128xf32>
      %c0_431 = arith.constant 0 : index
      %c0_432 = arith.constant 0 : index
      %c0_433 = arith.constant 0 : index
      %c0_434 = arith.constant 0 : index
      %440 = vector.load %arg4[%c0_431, %c0_432, %c0_433, %c0_434] : memref<1x8x8x128xf32, #tpu.memory_space<vmem>>, vector<1x8x8x128xf32>
      tpu.vector_store %arg4[%c0_431, %c0_432, %c0_433, %c0_434], %439 {strides = array<i32>} : memref<1x8x8x128xf32, #tpu.memory_space<vmem>>, vector<1x8x8x128xf32>,
    } else {
    }
    %c0 = arith.constant 0 : index
    %c0_1 = arith.constant 0 : index
    %c0_2 = arith.constant 0 : index
    %3 = vector.load %arg3[%c0, %c0_1, %c0_2] : memref<1x32x128xi8, #tpu.memory_space<vmem>>, vector<1x8x128xi8>
    %4 = vector.shape_cast %3 : vector<1x8x128xi8> to vector<8x128xi8>
    %5 = arith.extsi %4 : vector<8x128xi8> to vector<8x128xi32>
    %c0_i32_3 = arith.constant 0 : i32
    %6 = vector.broadcast %c0_i32_3 : i32 to vector<8x128xi32>
    %7 = arith.cmpi sge, %5, %6 : vector<8x128xi32>
    %c0_4 = arith.constant 0 : index
    %c0_5 = arith.constant 0 : index
    %c0_6 = arith.constant 0 : index
    %c0_7 = arith.constant 0 : index
    %8 = vector.load %arg2[%c0_4, %c0_5, %c0_6, %c0_7] : memref<1x4x32x128xf32, #tpu.memory_space<vmem>>, vector<1x1x8x128xf32>
    %9 = vector.shape_cast %8 : vector<1x1x8x128xf32> to vector<8x128xf32>
    %c0_8 = arith.constant 0 : index
    %c1 = arith.constant 1 : index
    %c0_9 = arith.constant 0 : index
    %c0_10 = arith.constant 0 : index
    %10 = vector.load %arg2[%c0_8, %c1, %c0_9, %c0_10] : memref<1x4x32x128xf32, #tpu.memory_space<vmem>>, vector<1x1x8x128xf32>
    %11 = vector.shape_cast %10 : vector<1x1x8x128xf32> to vector<8x128xf32>
    %12 = arith.maximumf %9, %11 : vector<8x128xf32>
    %c0_11 = arith.constant 0 : index
    %c2 = arith.constant 2 : index
    %c0_12 = arith.constant 0 : index
    %c0_13 = arith.constant 0 : index
    %13 = vector.load %arg2[%c0_11, %c2, %c0_12, %c0_13] : memref<1x4x32x128xf32, #tpu.memory_space<vmem>>, vector<1x1x8x128xf32>
    %14 = vector.shape_cast %13 : vector<1x1x8x128xf32> to vector<8x128xf32>
    %15 = arith.maximumf %12, %14 : vector<8x128xf32>
    %c0_14 = arith.constant 0 : index
    %c3 = arith.constant 3 : index
    %c0_15 = arith.constant 0 : index
    %c0_16 = arith.constant 0 : index
    %16 = vector.load %arg2[%c0_14, %c3, %c0_15, %c0_16] : memref<1x4x32x128xf32, #tpu.memory_space<vmem>>, vector<1x1x8x128xf32>
    %17 = vector.shape_cast %16 : vector<1x1x8x128xf32> to vector<8x128xf32>
    %18 = arith.maximumf %15, %17 : vector<8x128xf32>
    %cst = arith.constant 0.000000e+00 : f32
    %19 = vector.broadcast %cst : f32 to vector<8x128xf32>
    %c0_17 = arith.constant 0 : index
    %c0_18 = arith.constant 0 : index
    %c0_19 = arith.constant 0 : index
    %c0_20 = arith.constant 0 : index
    %20 = vector.load %arg2[%c0_17, %c0_18, %c0_19, %c0_20] : memref<1x4x32x128xf32, #tpu.memory_space<vmem>>, vector<1x1x8x128xf32>
    %21 = vector.shape_cast %20 : vector<1x1x8x128xf32> to vector<8x128xf32>
    %22 = arith.subf %21, %18 : vector<8x128xf32>
    %23 = math.exp %22 : vector<8x128xf32>
    %24 = arith.addf %19, %23 : vector<8x128xf32>
    %c0_21 = arith.constant 0 : index
    %c1_22 = arith.constant 1 : index
    %c0_23 = arith.constant 0 : index
    %c0_24 = arith.constant 0 : index
    %25 = vector.load %arg2[%c0_21, %c1_22, %c0_23, %c0_24] : memref<1x4x32x128xf32, #tpu.memory_space<vmem>>, vector<1x1x8x128xf32>
    %26 = vector.shape_cast %25 : vector<1x1x8x128xf32> to vector<8x128xf32>
    %27 = arith.subf %26, %18 : vector<8x128xf32>
    %28 = math.exp %27 : vector<8x128xf32>
    %29 = arith.addf %24, %28 : vector<8x128xf32>
    %c0_25 = arith.constant 0 : index
    %c2_26 = arith.constant 2 : index
    %c0_27 = arith.constant 0 : index
    %c0_28 = arith.constant 0 : index
    %30 = vector.load %arg2[%c0_25, %c2_26, %c0_27, %c0_28] : memref<1x4x32x128xf32, #tpu.memory_space<vmem>>, vector<1x1x8x128xf32>
    %31 = vector.shape_cast %30 : vector<1x1x8x128xf32> to vector<8x128xf32>
    %32 = arith.subf %31, %18 : vector<8x128xf32>
    %33 = math.exp %32 : vector<8x128xf32>
    %34 = arith.addf %29, %33 : vector<8x128xf32>
    %c0_29 = arith.constant 0 : index
    %c3_30 = arith.constant 3 : index
    %c0_31 = arith.constant 0 : index
    %c0_32 = arith.constant 0 : index
    %35 = vector.load %arg2[%c0_29, %c3_30, %c0_31, %c0_32] : memref<1x4x32x128xf32, #tpu.memory_space<vmem>>, vector<1x1x8x128xf32>
    %36 = vector.shape_cast %35 : vector<1x1x8x128xf32> to vector<8x128xf32>
    %37 = arith.subf %36, %18 : vector<8x128xf32>
    %38 = math.exp %37 : vector<8x128xf32>
    %39 = arith.addf %34, %38 : vector<8x128xf32>
    %cst_33 = arith.constant 1.000000e+00 : f32
    %40 = vector.broadcast %cst_33 : f32 to vector<8x128xf32>
    %41 = arith.divf %40, %39 : vector<8x128xf32>
    %cst_34 = arith.constant 0.000000e+00 : f32
    %42 = vector.broadcast %cst_34 : f32 to vector<8x128xf32>
    %43 = arith.select %7, %41, %42 : vector<8x128xi1>, vector<8x128xf32>
    %44 = arith.mulf %23, %43 : vector<8x128xf32>
    %c0_35 = arith.constant 0 : index
    %c0_36 = arith.constant 0 : index
    %c0_37 = arith.constant 0 : index
    %c0_38 = arith.constant 0 : index
    %45 = vector.load %arg4[%c0_35, %c0_36, %c0_37, %c0_38] : memref<1x8x8x128xf32, #tpu.memory_space<vmem>>, vector<1x1x8x128xf32>
    %46 = vector.shape_cast %45 : vector<1x1x8x128xf32> to vector<8x128xf32>
    %47 = arith.addf %46, %44 : vector<8x128xf32>
    %c0_39 = arith.constant 0 : index
    %c0_40 = arith.constant 0 : index
    %c0_41 = arith.constant 0 : index
    %c0_42 = arith.constant 0 : index
    %48 = vector.load %arg4[%c0_39, %c0_40, %c0_41, %c0_42] : memref<1x8x8x128xf32, #tpu.memory_space<vmem>>, vector<1x1x8x128xf32>
    %49 = vector.shape_cast %48 : vector<1x1x8x128xf32> to vector<8x128xf32>
    %50 = vector.shape_cast %47 : vector<8x128xf32> to vector<1x1x8x128xf32>
    tpu.vector_store %arg4[%c0_39, %c0_40, %c0_41, %c0_42], %50 {strides = array<i32>} : memref<1x8x8x128xf32, #tpu.memory_space<vmem>>, vector<1x1x8x128xf32>,
    %c0_43 = arith.constant 0 : index
    %c4 = arith.constant 4 : index
    %c0_44 = arith.constant 0 : index
    %c0_45 = arith.constant 0 : index
    %51 = vector.load %arg4[%c0_43, %c4, %c0_44, %c0_45] : memref<1x8x8x128xf32, #tpu.memory_space<vmem>>, vector<1x1x8x128xf32>
    %52 = vector.shape_cast %51 : vector<1x1x8x128xf32> to vector<8x128xf32>
    %c0_i32_46 = arith.constant 0 : i32
    %53 = vector.broadcast %c0_i32_46 : i32 to vector<8x128xi32>
    %54 = arith.cmpi eq, %5, %53 : vector<8x128xi32>
    %cst_47 = arith.constant 0.000000e+00 : f32
    %55 = vector.broadcast %cst_47 : f32 to vector<8x128xf32>
    %56 = arith.select %54, %44, %55 : vector<8x128xi1>, vector<8x128xf32>
    %57 = arith.addf %52, %56 : vector<8x128xf32>
    %c0_48 = arith.constant 0 : index
    %c4_49 = arith.constant 4 : index
    %c0_50 = arith.constant 0 : index
    %c0_51 = arith.constant 0 : index
    %58 = vector.load %arg4[%c0_48, %c4_49, %c0_50, %c0_51] : memref<1x8x8x128xf32, #tpu.memory_space<vmem>>, vector<1x1x8x128xf32>
    %59 = vector.shape_cast %58 : vector<1x1x8x128xf32> to vector<8x128xf32>
    %60 = vector.shape_cast %57 : vector<8x128xf32> to vector<1x1x8x128xf32>
    tpu.vector_store %arg4[%c0_48, %c4_49, %c0_50, %c0_51], %60 {strides = array<i32>} : memref<1x8x8x128xf32, #tpu.memory_space<vmem>>, vector<1x1x8x128xf32>,
    %61 = arith.mulf %28, %43 : vector<8x128xf32>
    %c0_52 = arith.constant 0 : index
    %c1_53 = arith.constant 1 : index
    %c0_54 = arith.constant 0 : index
    %c0_55 = arith.constant 0 : index
    %62 = vector.load %arg4[%c0_52, %c1_53, %c0_54, %c0_55] : memref<1x8x8x128xf32, #tpu.memory_space<vmem>>, vector<1x1x8x128xf32>
    %63 = vector.shape_cast %62 : vector<1x1x8x128xf32> to vector<8x128xf32>
    %64 = arith.addf %63, %61 : vector<8x128xf32>
    %c0_56 = arith.constant 0 : index
    %c1_57 = arith.constant 1 : index
    %c0_58 = arith.constant 0 : index
    %c0_59 = arith.constant 0 : index
    %65 = vector.load %arg4[%c0_56, %c1_57, %c0_58, %c0_59] : memref<1x8x8x128xf32, #tpu.memory_space<vmem>>, vector<1x1x8x128xf32>
    %66 = vector.shape_cast %65 : vector<1x1x8x128xf32> to vector<8x128xf32>
    %67 = vector.shape_cast %64 : vector<8x128xf32> to vector<1x1x8x128xf32>
    tpu.vector_store %arg4[%c0_56, %c1_57, %c0_58, %c0_59], %67 {strides = array<i32>} : memref<1x8x8x128xf32, #tpu.memory_space<vmem>>, vector<1x1x8x128xf32>,
    %c0_60 = arith.constant 0 : index
    %c5 = arith.constant 5 : index
    %c0_61 = arith.constant 0 : index
    %c0_62 = arith.constant 0 : index
    %68 = vector.load %arg4[%c0_60, %c5, %c0_61, %c0_62] : memref<1x8x8x128xf32, #tpu.memory_space<vmem>>, vector<1x1x8x128xf32>
    %69 = vector.shape_cast %68 : vector<1x1x8x128xf32> to vector<8x128xf32>
    %c1_i32 = arith.constant 1 : i32
    %70 = vector.broadcast %c1_i32 : i32 to vector<8x128xi32>
    %71 = arith.cmpi eq, %5, %70 : vector<8x128xi32>
    %cst_63 = arith.constant 0.000000e+00 : f32
    %72 = vector.broadcast %cst_63 : f32 to vector<8x128xf32>
    %73 = arith.select %71, %61, %72 : vector<8x128xi1>, vector<8x128xf32>
    %74 = arith.addf %69, %73 : vector<8x128xf32>
    %c0_64 = arith.constant 0 : index
    %c5_65 = arith.constant 5 : index
    %c0_66 = arith.constant 0 : index
    %c0_67 = arith.constant 0 : index
    %75 = vector.load %arg4[%c0_64, %c5_65, %c0_66, %c0_67] : memref<1x8x8x128xf32, #tpu.memory_space<vmem>>, vector<1x1x8x128xf32>
    %76 = vector.shape_cast %75 : vector<1x1x8x128xf32> to vector<8x128xf32>
    %77 = vector.shape_cast %74 : vector<8x128xf32> to vector<1x1x8x128xf32>
    tpu.vector_store %arg4[%c0_64, %c5_65, %c0_66, %c0_67], %77 {strides = array<i32>} : memref<1x8x8x128xf32, #tpu.memory_space<vmem>>, vector<1x1x8x128xf32>,
    %78 = arith.mulf %33, %43 : vector<8x128xf32>
    %c0_68 = arith.constant 0 : index
    %c2_69 = arith.constant 2 : index
    %c0_70 = arith.constant 0 : index
    %c0_71 = arith.constant 0 : index
    %79 = vector.load %arg4[%c0_68, %c2_69, %c0_70, %c0_71] : memref<1x8x8x128xf32, #tpu.memory_space<vmem>>, vector<1x1x8x128xf32>
    %80 = vector.shape_cast %79 : vector<1x1x8x128xf32> to vector<8x128xf32>
    %81 = arith.addf %80, %78 : vector<8x128xf32>
    %c0_72 = arith.constant 0 : index
    %c2_73 = arith.constant 2 : index
    %c0_74 = arith.constant 0 : index
    %c0_75 = arith.constant 0 : index
    %82 = vector.load %arg4[%c0_72, %c2_73, %c0_74, %c0_75] : memref<1x8x8x128xf32, #tpu.memory_space<vmem>>, vector<1x1x8x128xf32>
    %83 = vector.shape_cast %82 : vector<1x1x8x128xf32> to vector<8x128xf32>
    %84 = vector.shape_cast %81 : vector<8x128xf32> to vector<1x1x8x128xf32>
    tpu.vector_store %arg4[%c0_72, %c2_73, %c0_74, %c0_75], %84 {strides = array<i32>} : memref<1x8x8x128xf32, #tpu.memory_space<vmem>>, vector<1x1x8x128xf32>,
    %c0_76 = arith.constant 0 : index
    %c6 = arith.constant 6 : index
    %c0_77 = arith.constant 0 : index
    %c0_78 = arith.constant 0 : index
    %85 = vector.load %arg4[%c0_76, %c6, %c0_77, %c0_78] : memref<1x8x8x128xf32, #tpu.memory_space<vmem>>, vector<1x1x8x128xf32>
    %86 = vector.shape_cast %85 : vector<1x1x8x128xf32> to vector<8x128xf32>
    %c2_i32 = arith.constant 2 : i32
    %87 = vector.broadcast %c2_i32 : i32 to vector<8x128xi32>
    %88 = arith.cmpi eq, %5, %87 : vector<8x128xi32>
    %cst_79 = arith.constant 0.000000e+00 : f32
    %89 = vector.broadcast %cst_79 : f32 to vector<8x128xf32>
    %90 = arith.select %88, %78, %89 : vector<8x128xi1>, vector<8x128xf32>
    %91 = arith.addf %86, %90 : vector<8x128xf32>
    %c0_80 = arith.constant 0 : index
    %c6_81 = arith.constant 6 : index
    %c0_82 = arith.constant 0 : index
    %c0_83 = arith.constant 0 : index
    %92 = vector.load %arg4[%c0_80, %c6_81, %c0_82, %c0_83] : memref<1x8x8x128xf32, #tpu.memory_space<vmem>>, vector<1x1x8x128xf32>
    %93 = vector.shape_cast %92 : vector<1x1x8x128xf32> to vector<8x128xf32>
    %94 = vector.shape_cast %91 : vector<8x128xf32> to vector<1x1x8x128xf32>
    tpu.vector_store %arg4[%c0_80, %c6_81, %c0_82, %c0_83], %94 {strides = array<i32>} : memref<1x8x8x128xf32, #tpu.memory_space<vmem>>, vector<1x1x8x128xf32>,
    %95 = arith.mulf %38, %43 : vector<8x128xf32>
    %c0_84 = arith.constant 0 : index
    %c3_85 = arith.constant 3 : index
    %c0_86 = arith.constant 0 : index
    %c0_87 = arith.constant 0 : index
    %96 = vector.load %arg4[%c0_84, %c3_85, %c0_86, %c0_87] : memref<1x8x8x128xf32, #tpu.memory_space<vmem>>, vector<1x1x8x128xf32>
    %97 = vector.shape_cast %96 : vector<1x1x8x128xf32> to vector<8x128xf32>
    %98 = arith.addf %97, %95 : vector<8x128xf32>
    %c0_88 = arith.constant 0 : index
    %c3_89 = arith.constant 3 : index
    %c0_90 = arith.constant 0 : index
    %c0_91 = arith.constant 0 : index
    %99 = vector.load %arg4[%c0_88, %c3_89, %c0_90, %c0_91] : memref<1x8x8x128xf32, #tpu.memory_space<vmem>>, vector<1x1x8x128xf32>
    %100 = vector.shape_cast %99 : vector<1x1x8x128xf32> to vector<8x128xf32>
    %101 = vector.shape_cast %98 : vector<8x128xf32> to vector<1x1x8x128xf32>
    tpu.vector_store %arg4[%c0_88, %c3_89, %c0_90, %c0_91], %101 {strides = array<i32>} : memref<1x8x8x128xf32, #tpu.memory_space<vmem>>, vector<1x1x8x128xf32>,
    %c0_92 = arith.constant 0 : index
    %c7 = arith.constant 7 : index
    %c0_93 = arith.constant 0 : index
    %c0_94 = arith.constant 0 : index
    %102 = vector.load %arg4[%c0_92, %c7, %c0_93, %c0_94] : memref<1x8x8x128xf32, #tpu.memory_space<vmem>>, vector<1x1x8x128xf32>
    %103 = vector.shape_cast %102 : vector<1x1x8x128xf32> to vector<8x128xf32>
    %c3_i32 = arith.constant 3 : i32
    %104 = vector.broadcast %c3_i32 : i32 to vector<8x128xi32>
    %105 = arith.cmpi eq, %5, %104 : vector<8x128xi32>
    %cst_95 = arith.constant 0.000000e+00 : f32
    %106 = vector.broadcast %cst_95 : f32 to vector<8x128xf32>
    %107 = arith.select %105, %95, %106 : vector<8x128xi1>, vector<8x128xf32>
    %108 = arith.addf %103, %107 : vector<8x128xf32>
    %c0_96 = arith.constant 0 : index
    %c7_97 = arith.constant 7 : index
    %c0_98 = arith.constant 0 : index
    %c0_99 = arith.constant 0 : index
    %109 = vector.load %arg4[%c0_96, %c7_97, %c0_98, %c0_99] : memref<1x8x8x128xf32, #tpu.memory_space<vmem>>, vector<1x1x8x128xf32>
    %110 = vector.shape_cast %109 : vector<1x1x8x128xf32> to vector<8x128xf32>
    %111 = vector.shape_cast %108 : vector<8x128xf32> to vector<1x1x8x128xf32>
    tpu.vector_store %arg4[%c0_96, %c7_97, %c0_98, %c0_99], %111 {strides = array<i32>} : memref<1x8x8x128xf32, #tpu.memory_space<vmem>>, vector<1x1x8x128xf32>,
    %c0_100 = arith.constant 0 : index
    %c8 = arith.constant 8 : index
    %c0_101 = arith.constant 0 : index
    %112 = vector.load %arg3[%c0_100, %c8, %c0_101] : memref<1x32x128xi8, #tpu.memory_space<vmem>>, vector<1x8x128xi8>
    %113 = vector.shape_cast %112 : vector<1x8x128xi8> to vector<8x128xi8>
    %114 = arith.extsi %113 : vector<8x128xi8> to vector<8x128xi32>
    %c0_i32_102 = arith.constant 0 : i32
    %115 = vector.broadcast %c0_i32_102 : i32 to vector<8x128xi32>
    %116 = arith.cmpi sge, %114, %115 : vector<8x128xi32>
    %c0_103 = arith.constant 0 : index
    %c0_104 = arith.constant 0 : index
    %c8_105 = arith.constant 8 : index
    %c0_106 = arith.constant 0 : index
    %117 = vector.load %arg2[%c0_103, %c0_104, %c8_105, %c0_106] : memref<1x4x32x128xf32, #tpu.memory_space<vmem>>, vector<1x1x8x128xf32>
    %118 = vector.shape_cast %117 : vector<1x1x8x128xf32> to vector<8x128xf32>
    %c0_107 = arith.constant 0 : index
    %c1_108 = arith.constant 1 : index
    %c8_109 = arith.constant 8 : index
    %c0_110 = arith.constant 0 : index
    %119 = vector.load %arg2[%c0_107, %c1_108, %c8_109, %c0_110] : memref<1x4x32x128xf32, #tpu.memory_space<vmem>>, vector<1x1x8x128xf32>
    %120 = vector.shape_cast %119 : vector<1x1x8x128xf32> to vector<8x128xf32>
    %121 = arith.maximumf %118, %120 : vector<8x128xf32>
    %c0_111 = arith.constant 0 : index
    %c2_112 = arith.constant 2 : index
    %c8_113 = arith.constant 8 : index
    %c0_114 = arith.constant 0 : index
    %122 = vector.load %arg2[%c0_111, %c2_112, %c8_113, %c0_114] : memref<1x4x32x128xf32, #tpu.memory_space<vmem>>, vector<1x1x8x128xf32>
    %123 = vector.shape_cast %122 : vector<1x1x8x128xf32> to vector<8x128xf32>
    %124 = arith.maximumf %121, %123 : vector<8x128xf32>
    %c0_115 = arith.constant 0 : index
    %c3_116 = arith.constant 3 : index
    %c8_117 = arith.constant 8 : index
    %c0_118 = arith.constant 0 : index
    %125 = vector.load %arg2[%c0_115, %c3_116, %c8_117, %c0_118] : memref<1x4x32x128xf32, #tpu.memory_space<vmem>>, vector<1x1x8x128xf32>
    %126 = vector.shape_cast %125 : vector<1x1x8x128xf32> to vector<8x128xf32>
    %127 = arith.maximumf %124, %126 : vector<8x128xf32>
    %cst_119 = arith.constant 0.000000e+00 : f32
    %128 = vector.broadcast %cst_119 : f32 to vector<8x128xf32>
    %c0_120 = arith.constant 0 : index
    %c0_121 = arith.constant 0 : index
    %c8_122 = arith.constant 8 : index
    %c0_123 = arith.constant 0 : index
    %129 = vector.load %arg2[%c0_120, %c0_121, %c8_122, %c0_123] : memref<1x4x32x128xf32, #tpu.memory_space<vmem>>, vector<1x1x8x128xf32>
    %130 = vector.shape_cast %129 : vector<1x1x8x128xf32> to vector<8x128xf32>
    %131 = arith.subf %130, %127 : vector<8x128xf32>
    %132 = math.exp %131 : vector<8x128xf32>
    %133 = arith.addf %128, %132 : vector<8x128xf32>
    %c0_124 = arith.constant 0 : index
    %c1_125 = arith.constant 1 : index
    %c8_126 = arith.constant 8 : index
    %c0_127 = arith.constant 0 : index
    %134 = vector.load %arg2[%c0_124, %c1_125, %c8_126, %c0_127] : memref<1x4x32x128xf32, #tpu.memory_space<vmem>>, vector<1x1x8x128xf32>
    %135 = vector.shape_cast %134 : vector<1x1x8x128xf32> to vector<8x128xf32>
    %136 = arith.subf %135, %127 : vector<8x128xf32>
    %137 = math.exp %136 : vector<8x128xf32>
    %138 = arith.addf %133, %137 : vector<8x128xf32>
    %c0_128 = arith.constant 0 : index
    %c2_129 = arith.constant 2 : index
    %c8_130 = arith.constant 8 : index
    %c0_131 = arith.constant 0 : index
    %139 = vector.load %arg2[%c0_128, %c2_129, %c8_130, %c0_131] : memref<1x4x32x128xf32, #tpu.memory_space<vmem>>, vector<1x1x8x128xf32>
    %140 = vector.shape_cast %139 : vector<1x1x8x128xf32> to vector<8x128xf32>
    %141 = arith.subf %140, %127 : vector<8x128xf32>
    %142 = math.exp %141 : vector<8x128xf32>
    %143 = arith.addf %138, %142 : vector<8x128xf32>
    %c0_132 = arith.constant 0 : index
    %c3_133 = arith.constant 3 : index
    %c8_134 = arith.constant 8 : index
    %c0_135 = arith.constant 0 : index
    %144 = vector.load %arg2[%c0_132, %c3_133, %c8_134, %c0_135] : memref<1x4x32x128xf32, #tpu.memory_space<vmem>>, vector<1x1x8x128xf32>
    %145 = vector.shape_cast %144 : vector<1x1x8x128xf32> to vector<8x128xf32>
    %146 = arith.subf %145, %127 : vector<8x128xf32>
    %147 = math.exp %146 : vector<8x128xf32>
    %148 = arith.addf %143, %147 : vector<8x128xf32>
    %cst_136 = arith.constant 1.000000e+00 : f32
    %149 = vector.broadcast %cst_136 : f32 to vector<8x128xf32>
    %150 = arith.divf %149, %148 : vector<8x128xf32>
    %cst_137 = arith.constant 0.000000e+00 : f32
    %151 = vector.broadcast %cst_137 : f32 to vector<8x128xf32>
    %152 = arith.select %116, %150, %151 : vector<8x128xi1>, vector<8x128xf32>
    %153 = arith.mulf %132, %152 : vector<8x128xf32>
    %c0_138 = arith.constant 0 : index
    %c0_139 = arith.constant 0 : index
    %c0_140 = arith.constant 0 : index
    %c0_141 = arith.constant 0 : index
    %154 = vector.load %arg4[%c0_138, %c0_139, %c0_140, %c0_141] : memref<1x8x8x128xf32, #tpu.memory_space<vmem>>, vector<1x1x8x128xf32>
    %155 = vector.shape_cast %154 : vector<1x1x8x128xf32> to vector<8x128xf32>
    %156 = arith.addf %155, %153 : vector<8x128xf32>
    %c0_142 = arith.constant 0 : index
    %c0_143 = arith.constant 0 : index
    %c0_144 = arith.constant 0 : index
    %c0_145 = arith.constant 0 : index
    %157 = vector.load %arg4[%c0_142, %c0_143, %c0_144, %c0_145] : memref<1x8x8x128xf32, #tpu.memory_space<vmem>>, vector<1x1x8x128xf32>
    %158 = vector.shape_cast %157 : vector<1x1x8x128xf32> to vector<8x128xf32>
    %159 = vector.shape_cast %156 : vector<8x128xf32> to vector<1x1x8x128xf32>
    tpu.vector_store %arg4[%c0_142, %c0_143, %c0_144, %c0_145], %159 {strides = array<i32>} : memref<1x8x8x128xf32, #tpu.memory_space<vmem>>, vector<1x1x8x128xf32>,
    %c0_146 = arith.constant 0 : index
    %c4_147 = arith.constant 4 : index
    %c0_148 = arith.constant 0 : index
    %c0_149 = arith.constant 0 : index
    %160 = vector.load %arg4[%c0_146, %c4_147, %c0_148, %c0_149] : memref<1x8x8x128xf32, #tpu.memory_space<vmem>>, vector<1x1x8x128xf32>
    %161 = vector.shape_cast %160 : vector<1x1x8x128xf32> to vector<8x128xf32>
    %c0_i32_150 = arith.constant 0 : i32
    %162 = vector.broadcast %c0_i32_150 : i32 to vector<8x128xi32>
    %163 = arith.cmpi eq, %114, %162 : vector<8x128xi32>
    %cst_151 = arith.constant 0.000000e+00 : f32
    %164 = vector.broadcast %cst_151 : f32 to vector<8x128xf32>
    %165 = arith.select %163, %153, %164 : vector<8x128xi1>, vector<8x128xf32>
    %166 = arith.addf %161, %165 : vector<8x128xf32>
    %c0_152 = arith.constant 0 : index
    %c4_153 = arith.constant 4 : index
    %c0_154 = arith.constant 0 : index
    %c0_155 = arith.constant 0 : index
    %167 = vector.load %arg4[%c0_152, %c4_153, %c0_154, %c0_155] : memref<1x8x8x128xf32, #tpu.memory_space<vmem>>, vector<1x1x8x128xf32>
    %168 = vector.shape_cast %167 : vector<1x1x8x128xf32> to vector<8x128xf32>
    %169 = vector.shape_cast %166 : vector<8x128xf32> to vector<1x1x8x128xf32>
    tpu.vector_store %arg4[%c0_152, %c4_153, %c0_154, %c0_155], %169 {strides = array<i32>} : memref<1x8x8x128xf32, #tpu.memory_space<vmem>>, vector<1x1x8x128xf32>,
    %170 = arith.mulf %137, %152 : vector<8x128xf32>
    %c0_156 = arith.constant 0 : index
    %c1_157 = arith.constant 1 : index
    %c0_158 = arith.constant 0 : index
    %c0_159 = arith.constant 0 : index
    %171 = vector.load %arg4[%c0_156, %c1_157, %c0_158, %c0_159] : memref<1x8x8x128xf32, #tpu.memory_space<vmem>>, vector<1x1x8x128xf32>
    %172 = vector.shape_cast %171 : vector<1x1x8x128xf32> to vector<8x128xf32>
    %173 = arith.addf %172, %170 : vector<8x128xf32>
    %c0_160 = arith.constant 0 : index
    %c1_161 = arith.constant 1 : index
    %c0_162 = arith.constant 0 : index
    %c0_163 = arith.constant 0 : index
    %174 = vector.load %arg4[%c0_160, %c1_161, %c0_162, %c0_163] : memref<1x8x8x128xf32, #tpu.memory_space<vmem>>, vector<1x1x8x128xf32>
    %175 = vector.shape_cast %174 : vector<1x1x8x128xf32> to vector<8x128xf32>
    %176 = vector.shape_cast %173 : vector<8x128xf32> to vector<1x1x8x128xf32>
    tpu.vector_store %arg4[%c0_160, %c1_161, %c0_162, %c0_163], %176 {strides = array<i32>} : memref<1x8x8x128xf32, #tpu.memory_space<vmem>>, vector<1x1x8x128xf32>,
    %c0_164 = arith.constant 0 : index
    %c5_165 = arith.constant 5 : index
    %c0_166 = arith.constant 0 : index
    %c0_167 = arith.constant 0 : index
    %177 = vector.load %arg4[%c0_164, %c5_165, %c0_166, %c0_167] : memref<1x8x8x128xf32, #tpu.memory_space<vmem>>, vector<1x1x8x128xf32>
    %178 = vector.shape_cast %177 : vector<1x1x8x128xf32> to vector<8x128xf32>
    %c1_i32_168 = arith.constant 1 : i32
    %179 = vector.broadcast %c1_i32_168 : i32 to vector<8x128xi32>
    %180 = arith.cmpi eq, %114, %179 : vector<8x128xi32>
    %cst_169 = arith.constant 0.000000e+00 : f32
    %181 = vector.broadcast %cst_169 : f32 to vector<8x128xf32>
    %182 = arith.select %180, %170, %181 : vector<8x128xi1>, vector<8x128xf32>
    %183 = arith.addf %178, %182 : vector<8x128xf32>
    %c0_170 = arith.constant 0 : index
    %c5_171 = arith.constant 5 : index
    %c0_172 = arith.constant 0 : index
    %c0_173 = arith.constant 0 : index
    %184 = vector.load %arg4[%c0_170, %c5_171, %c0_172, %c0_173] : memref<1x8x8x128xf32, #tpu.memory_space<vmem>>, vector<1x1x8x128xf32>
    %185 = vector.shape_cast %184 : vector<1x1x8x128xf32> to vector<8x128xf32>
    %186 = vector.shape_cast %183 : vector<8x128xf32> to vector<1x1x8x128xf32>
    tpu.vector_store %arg4[%c0_170, %c5_171, %c0_172, %c0_173], %186 {strides = array<i32>} : memref<1x8x8x128xf32, #tpu.memory_space<vmem>>, vector<1x1x8x128xf32>,
    %187 = arith.mulf %142, %152 : vector<8x128xf32>
    %c0_174 = arith.constant 0 : index
    %c2_175 = arith.constant 2 : index
    %c0_176 = arith.constant 0 : index
    %c0_177 = arith.constant 0 : index
    %188 = vector.load %arg4[%c0_174, %c2_175, %c0_176, %c0_177] : memref<1x8x8x128xf32, #tpu.memory_space<vmem>>, vector<1x1x8x128xf32>
    %189 = vector.shape_cast %188 : vector<1x1x8x128xf32> to vector<8x128xf32>
    %190 = arith.addf %189, %187 : vector<8x128xf32>
    %c0_178 = arith.constant 0 : index
    %c2_179 = arith.constant 2 : index
    %c0_180 = arith.constant 0 : index
    %c0_181 = arith.constant 0 : index
    %191 = vector.load %arg4[%c0_178, %c2_179, %c0_180, %c0_181] : memref<1x8x8x128xf32, #tpu.memory_space<vmem>>, vector<1x1x8x128xf32>
    %192 = vector.shape_cast %191 : vector<1x1x8x128xf32> to vector<8x128xf32>
    %193 = vector.shape_cast %190 : vector<8x128xf32> to vector<1x1x8x128xf32>
    tpu.vector_store %arg4[%c0_178, %c2_179, %c0_180, %c0_181], %193 {strides = array<i32>} : memref<1x8x8x128xf32, #tpu.memory_space<vmem>>, vector<1x1x8x128xf32>,
    %c0_182 = arith.constant 0 : index
    %c6_183 = arith.constant 6 : index
    %c0_184 = arith.constant 0 : index
    %c0_185 = arith.constant 0 : index
    %194 = vector.load %arg4[%c0_182, %c6_183, %c0_184, %c0_185] : memref<1x8x8x128xf32, #tpu.memory_space<vmem>>, vector<1x1x8x128xf32>
    %195 = vector.shape_cast %194 : vector<1x1x8x128xf32> to vector<8x128xf32>
    %c2_i32_186 = arith.constant 2 : i32
    %196 = vector.broadcast %c2_i32_186 : i32 to vector<8x128xi32>
    %197 = arith.cmpi eq, %114, %196 : vector<8x128xi32>
    %cst_187 = arith.constant 0.000000e+00 : f32
    %198 = vector.broadcast %cst_187 : f32 to vector<8x128xf32>
    %199 = arith.select %197, %187, %198 : vector<8x128xi1>, vector<8x128xf32>
    %200 = arith.addf %195, %199 : vector<8x128xf32>
    %c0_188 = arith.constant 0 : index
    %c6_189 = arith.constant 6 : index
    %c0_190 = arith.constant 0 : index
    %c0_191 = arith.constant 0 : index
    %201 = vector.load %arg4[%c0_188, %c6_189, %c0_190, %c0_191] : memref<1x8x8x128xf32, #tpu.memory_space<vmem>>, vector<1x1x8x128xf32>
    %202 = vector.shape_cast %201 : vector<1x1x8x128xf32> to vector<8x128xf32>
    %203 = vector.shape_cast %200 : vector<8x128xf32> to vector<1x1x8x128xf32>
    tpu.vector_store %arg4[%c0_188, %c6_189, %c0_190, %c0_191], %203 {strides = array<i32>} : memref<1x8x8x128xf32, #tpu.memory_space<vmem>>, vector<1x1x8x128xf32>,
    %204 = arith.mulf %147, %152 : vector<8x128xf32>
    %c0_192 = arith.constant 0 : index
    %c3_193 = arith.constant 3 : index
    %c0_194 = arith.constant 0 : index
    %c0_195 = arith.constant 0 : index
    %205 = vector.load %arg4[%c0_192, %c3_193, %c0_194, %c0_195] : memref<1x8x8x128xf32, #tpu.memory_space<vmem>>, vector<1x1x8x128xf32>
    %206 = vector.shape_cast %205 : vector<1x1x8x128xf32> to vector<8x128xf32>
    %207 = arith.addf %206, %204 : vector<8x128xf32>
    %c0_196 = arith.constant 0 : index
    %c3_197 = arith.constant 3 : index
    %c0_198 = arith.constant 0 : index
    %c0_199 = arith.constant 0 : index
    %208 = vector.load %arg4[%c0_196, %c3_197, %c0_198, %c0_199] : memref<1x8x8x128xf32, #tpu.memory_space<vmem>>, vector<1x1x8x128xf32>
    %209 = vector.shape_cast %208 : vector<1x1x8x128xf32> to vector<8x128xf32>
    %210 = vector.shape_cast %207 : vector<8x128xf32> to vector<1x1x8x128xf32>
    tpu.vector_store %arg4[%c0_196, %c3_197, %c0_198, %c0_199], %210 {strides = array<i32>} : memref<1x8x8x128xf32, #tpu.memory_space<vmem>>, vector<1x1x8x128xf32>,
    %c0_200 = arith.constant 0 : index
    %c7_201 = arith.constant 7 : index
    %c0_202 = arith.constant 0 : index
    %c0_203 = arith.constant 0 : index
    %211 = vector.load %arg4[%c0_200, %c7_201, %c0_202, %c0_203] : memref<1x8x8x128xf32, #tpu.memory_space<vmem>>, vector<1x1x8x128xf32>
    %212 = vector.shape_cast %211 : vector<1x1x8x128xf32> to vector<8x128xf32>
    %c3_i32_204 = arith.constant 3 : i32
    %213 = vector.broadcast %c3_i32_204 : i32 to vector<8x128xi32>
    %214 = arith.cmpi eq, %114, %213 : vector<8x128xi32>
    %cst_205 = arith.constant 0.000000e+00 : f32
    %215 = vector.broadcast %cst_205 : f32 to vector<8x128xf32>
    %216 = arith.select %214, %204, %215 : vector<8x128xi1>, vector<8x128xf32>
    %217 = arith.addf %212, %216 : vector<8x128xf32>
    %c0_206 = arith.constant 0 : index
    %c7_207 = arith.constant 7 : index
    %c0_208 = arith.constant 0 : index
    %c0_209 = arith.constant 0 : index
    %218 = vector.load %arg4[%c0_206, %c7_207, %c0_208, %c0_209] : memref<1x8x8x128xf32, #tpu.memory_space<vmem>>, vector<1x1x8x128xf32>
    %219 = vector.shape_cast %218 : vector<1x1x8x128xf32> to vector<8x128xf32>
    %220 = vector.shape_cast %217 : vector<8x128xf32> to vector<1x1x8x128xf32>
    tpu.vector_store %arg4[%c0_206, %c7_207, %c0_208, %c0_209], %220 {strides = array<i32>} : memref<1x8x8x128xf32, #tpu.memory_space<vmem>>, vector<1x1x8x128xf32>,
    %c0_210 = arith.constant 0 : index
    %c16 = arith.constant 16 : index
    %c0_211 = arith.constant 0 : index
    %221 = vector.load %arg3[%c0_210, %c16, %c0_211] : memref<1x32x128xi8, #tpu.memory_space<vmem>>, vector<1x8x128xi8>
    %222 = vector.shape_cast %221 : vector<1x8x128xi8> to vector<8x128xi8>
    %223 = arith.extsi %222 : vector<8x128xi8> to vector<8x128xi32>
    %c0_i32_212 = arith.constant 0 : i32
    %224 = vector.broadcast %c0_i32_212 : i32 to vector<8x128xi32>
    %225 = arith.cmpi sge, %223, %224 : vector<8x128xi32>
    %c0_213 = arith.constant 0 : index
    %c0_214 = arith.constant 0 : index
    %c16_215 = arith.constant 16 : index
    %c0_216 = arith.constant 0 : index
    %226 = vector.load %arg2[%c0_213, %c0_214, %c16_215, %c0_216] : memref<1x4x32x128xf32, #tpu.memory_space<vmem>>, vector<1x1x8x128xf32>
    %227 = vector.shape_cast %226 : vector<1x1x8x128xf32> to vector<8x128xf32>
    %c0_217 = arith.constant 0 : index
    %c1_218 = arith.constant 1 : index
    %c16_219 = arith.constant 16 : index
    %c0_220 = arith.constant 0 : index
    %228 = vector.load %arg2[%c0_217, %c1_218, %c16_219, %c0_220] : memref<1x4x32x128xf32, #tpu.memory_space<vmem>>, vector<1x1x8x128xf32>
    %229 = vector.shape_cast %228 : vector<1x1x8x128xf32> to vector<8x128xf32>
    %230 = arith.maximumf %227, %229 : vector<8x128xf32>
    %c0_221 = arith.constant 0 : index
    %c2_222 = arith.constant 2 : index
    %c16_223 = arith.constant 16 : index
    %c0_224 = arith.constant 0 : index
    %231 = vector.load %arg2[%c0_221, %c2_222, %c16_223, %c0_224] : memref<1x4x32x128xf32, #tpu.memory_space<vmem>>, vector<1x1x8x128xf32>
    %232 = vector.shape_cast %231 : vector<1x1x8x128xf32> to vector<8x128xf32>
    %233 = arith.maximumf %230, %232 : vector<8x128xf32>
    %c0_225 = arith.constant 0 : index
    %c3_226 = arith.constant 3 : index
    %c16_227 = arith.constant 16 : index
    %c0_228 = arith.constant 0 : index
    %234 = vector.load %arg2[%c0_225, %c3_226, %c16_227, %c0_228] : memref<1x4x32x128xf32, #tpu.memory_space<vmem>>, vector<1x1x8x128xf32>
    %235 = vector.shape_cast %234 : vector<1x1x8x128xf32> to vector<8x128xf32>
    %236 = arith.maximumf %233, %235 : vector<8x128xf32>
    %cst_229 = arith.constant 0.000000e+00 : f32
    %237 = vector.broadcast %cst_229 : f32 to vector<8x128xf32>
    %c0_230 = arith.constant 0 : index
    %c0_231 = arith.constant 0 : index
    %c16_232 = arith.constant 16 : index
    %c0_233 = arith.constant 0 : index
    %238 = vector.load %arg2[%c0_230, %c0_231, %c16_232, %c0_233] : memref<1x4x32x128xf32, #tpu.memory_space<vmem>>, vector<1x1x8x128xf32>
    %239 = vector.shape_cast %238 : vector<1x1x8x128xf32> to vector<8x128xf32>
    %240 = arith.subf %239, %236 : vector<8x128xf32>
    %241 = math.exp %240 : vector<8x128xf32>
    %242 = arith.addf %237, %241 : vector<8x128xf32>
    %c0_234 = arith.constant 0 : index
    %c1_235 = arith.constant 1 : index
    %c16_236 = arith.constant 16 : index
    %c0_237 = arith.constant 0 : index
    %243 = vector.load %arg2[%c0_234, %c1_235, %c16_236, %c0_237] : memref<1x4x32x128xf32, #tpu.memory_space<vmem>>, vector<1x1x8x128xf32>
    %244 = vector.shape_cast %243 : vector<1x1x8x128xf32> to vector<8x128xf32>
    %245 = arith.subf %244, %236 : vector<8x128xf32>
    %246 = math.exp %245 : vector<8x128xf32>
    %247 = arith.addf %242, %246 : vector<8x128xf32>
    %c0_238 = arith.constant 0 : index
    %c2_239 = arith.constant 2 : index
    %c16_240 = arith.constant 16 : index
    %c0_241 = arith.constant 0 : index
    %248 = vector.load %arg2[%c0_238, %c2_239, %c16_240, %c0_241] : memref<1x4x32x128xf32, #tpu.memory_space<vmem>>, vector<1x1x8x128xf32>
    %249 = vector.shape_cast %248 : vector<1x1x8x128xf32> to vector<8x128xf32>
    %250 = arith.subf %249, %236 : vector<8x128xf32>
    %251 = math.exp %250 : vector<8x128xf32>
    %252 = arith.addf %247, %251 : vector<8x128xf32>
    %c0_242 = arith.constant 0 : index
    %c3_243 = arith.constant 3 : index
    %c16_244 = arith.constant 16 : index
    %c0_245 = arith.constant 0 : index
    %253 = vector.load %arg2[%c0_242, %c3_243, %c16_244, %c0_245] : memref<1x4x32x128xf32, #tpu.memory_space<vmem>>, vector<1x1x8x128xf32>
    %254 = vector.shape_cast %253 : vector<1x1x8x128xf32> to vector<8x128xf32>
    %255 = arith.subf %254, %236 : vector<8x128xf32>
    %256 = math.exp %255 : vector<8x128xf32>
    %257 = arith.addf %252, %256 : vector<8x128xf32>
    %cst_246 = arith.constant 1.000000e+00 : f32
    %258 = vector.broadcast %cst_246 : f32 to vector<8x128xf32>
    %259 = arith.divf %258, %257 : vector<8x128xf32>
    %cst_247 = arith.constant 0.000000e+00 : f32
    %260 = vector.broadcast %cst_247 : f32 to vector<8x128xf32>
    %261 = arith.select %225, %259, %260 : vector<8x128xi1>, vector<8x128xf32>
    %262 = arith.mulf %241, %261 : vector<8x128xf32>
    %c0_248 = arith.constant 0 : index
    %c0_249 = arith.constant 0 : index
    %c0_250 = arith.constant 0 : index
    %c0_251 = arith.constant 0 : index
    %263 = vector.load %arg4[%c0_248, %c0_249, %c0_250, %c0_251] : memref<1x8x8x128xf32, #tpu.memory_space<vmem>>, vector<1x1x8x128xf32>
    %264 = vector.shape_cast %263 : vector<1x1x8x128xf32> to vector<8x128xf32>
    %265 = arith.addf %264, %262 : vector<8x128xf32>
    %c0_252 = arith.constant 0 : index
    %c0_253 = arith.constant 0 : index
    %c0_254 = arith.constant 0 : index
    %c0_255 = arith.constant 0 : index
    %266 = vector.load %arg4[%c0_252, %c0_253, %c0_254, %c0_255] : memref<1x8x8x128xf32, #tpu.memory_space<vmem>>, vector<1x1x8x128xf32>
    %267 = vector.shape_cast %266 : vector<1x1x8x128xf32> to vector<8x128xf32>
    %268 = vector.shape_cast %265 : vector<8x128xf32> to vector<1x1x8x128xf32>
    tpu.vector_store %arg4[%c0_252, %c0_253, %c0_254, %c0_255], %268 {strides = array<i32>} : memref<1x8x8x128xf32, #tpu.memory_space<vmem>>, vector<1x1x8x128xf32>,
    %c0_256 = arith.constant 0 : index
    %c4_257 = arith.constant 4 : index
    %c0_258 = arith.constant 0 : index
    %c0_259 = arith.constant 0 : index
    %269 = vector.load %arg4[%c0_256, %c4_257, %c0_258, %c0_259] : memref<1x8x8x128xf32, #tpu.memory_space<vmem>>, vector<1x1x8x128xf32>
    %270 = vector.shape_cast %269 : vector<1x1x8x128xf32> to vector<8x128xf32>
    %c0_i32_260 = arith.constant 0 : i32
    %271 = vector.broadcast %c0_i32_260 : i32 to vector<8x128xi32>
    %272 = arith.cmpi eq, %223, %271 : vector<8x128xi32>
    %cst_261 = arith.constant 0.000000e+00 : f32
    %273 = vector.broadcast %cst_261 : f32 to vector<8x128xf32>
    %274 = arith.select %272, %262, %273 : vector<8x128xi1>, vector<8x128xf32>
    %275 = arith.addf %270, %274 : vector<8x128xf32>
    %c0_262 = arith.constant 0 : index
    %c4_263 = arith.constant 4 : index
    %c0_264 = arith.constant 0 : index
    %c0_265 = arith.constant 0 : index
    %276 = vector.load %arg4[%c0_262, %c4_263, %c0_264, %c0_265] : memref<1x8x8x128xf32, #tpu.memory_space<vmem>>, vector<1x1x8x128xf32>
    %277 = vector.shape_cast %276 : vector<1x1x8x128xf32> to vector<8x128xf32>
    %278 = vector.shape_cast %275 : vector<8x128xf32> to vector<1x1x8x128xf32>
    tpu.vector_store %arg4[%c0_262, %c4_263, %c0_264, %c0_265], %278 {strides = array<i32>} : memref<1x8x8x128xf32, #tpu.memory_space<vmem>>, vector<1x1x8x128xf32>,
    %279 = arith.mulf %246, %261 : vector<8x128xf32>
    %c0_266 = arith.constant 0 : index
    %c1_267 = arith.constant 1 : index
    %c0_268 = arith.constant 0 : index
    %c0_269 = arith.constant 0 : index
    %280 = vector.load %arg4[%c0_266, %c1_267, %c0_268, %c0_269] : memref<1x8x8x128xf32, #tpu.memory_space<vmem>>, vector<1x1x8x128xf32>
    %281 = vector.shape_cast %280 : vector<1x1x8x128xf32> to vector<8x128xf32>
    %282 = arith.addf %281, %279 : vector<8x128xf32>
    %c0_270 = arith.constant 0 : index
    %c1_271 = arith.constant 1 : index
    %c0_272 = arith.constant 0 : index
    %c0_273 = arith.constant 0 : index
    %283 = vector.load %arg4[%c0_270, %c1_271, %c0_272, %c0_273] : memref<1x8x8x128xf32, #tpu.memory_space<vmem>>, vector<1x1x8x128xf32>
    %284 = vector.shape_cast %283 : vector<1x1x8x128xf32> to vector<8x128xf32>
    %285 = vector.shape_cast %282 : vector<8x128xf32> to vector<1x1x8x128xf32>
    tpu.vector_store %arg4[%c0_270, %c1_271, %c0_272, %c0_273], %285 {strides = array<i32>} : memref<1x8x8x128xf32, #tpu.memory_space<vmem>>, vector<1x1x8x128xf32>,
    %c0_274 = arith.constant 0 : index
    %c5_275 = arith.constant 5 : index
    %c0_276 = arith.constant 0 : index
    %c0_277 = arith.constant 0 : index
    %286 = vector.load %arg4[%c0_274, %c5_275, %c0_276, %c0_277] : memref<1x8x8x128xf32, #tpu.memory_space<vmem>>, vector<1x1x8x128xf32>
    %287 = vector.shape_cast %286 : vector<1x1x8x128xf32> to vector<8x128xf32>
    %c1_i32_278 = arith.constant 1 : i32
    %288 = vector.broadcast %c1_i32_278 : i32 to vector<8x128xi32>
    %289 = arith.cmpi eq, %223, %288 : vector<8x128xi32>
    %cst_279 = arith.constant 0.000000e+00 : f32
    %290 = vector.broadcast %cst_279 : f32 to vector<8x128xf32>
    %291 = arith.select %289, %279, %290 : vector<8x128xi1>, vector<8x128xf32>
    %292 = arith.addf %287, %291 : vector<8x128xf32>
    %c0_280 = arith.constant 0 : index
    %c5_281 = arith.constant 5 : index
    %c0_282 = arith.constant 0 : index
    %c0_283 = arith.constant 0 : index
    %293 = vector.load %arg4[%c0_280, %c5_281, %c0_282, %c0_283] : memref<1x8x8x128xf32, #tpu.memory_space<vmem>>, vector<1x1x8x128xf32>
    %294 = vector.shape_cast %293 : vector<1x1x8x128xf32> to vector<8x128xf32>
    %295 = vector.shape_cast %292 : vector<8x128xf32> to vector<1x1x8x128xf32>
    tpu.vector_store %arg4[%c0_280, %c5_281, %c0_282, %c0_283], %295 {strides = array<i32>} : memref<1x8x8x128xf32, #tpu.memory_space<vmem>>, vector<1x1x8x128xf32>,
    %296 = arith.mulf %251, %261 : vector<8x128xf32>
    %c0_284 = arith.constant 0 : index
    %c2_285 = arith.constant 2 : index
    %c0_286 = arith.constant 0 : index
    %c0_287 = arith.constant 0 : index
    %297 = vector.load %arg4[%c0_284, %c2_285, %c0_286, %c0_287] : memref<1x8x8x128xf32, #tpu.memory_space<vmem>>, vector<1x1x8x128xf32>
    %298 = vector.shape_cast %297 : vector<1x1x8x128xf32> to vector<8x128xf32>
    %299 = arith.addf %298, %296 : vector<8x128xf32>
    %c0_288 = arith.constant 0 : index
    %c2_289 = arith.constant 2 : index
    %c0_290 = arith.constant 0 : index
    %c0_291 = arith.constant 0 : index
    %300 = vector.load %arg4[%c0_288, %c2_289, %c0_290, %c0_291] : memref<1x8x8x128xf32, #tpu.memory_space<vmem>>, vector<1x1x8x128xf32>
    %301 = vector.shape_cast %300 : vector<1x1x8x128xf32> to vector<8x128xf32>
    %302 = vector.shape_cast %299 : vector<8x128xf32> to vector<1x1x8x128xf32>
    tpu.vector_store %arg4[%c0_288, %c2_289, %c0_290, %c0_291], %302 {strides = array<i32>} : memref<1x8x8x128xf32, #tpu.memory_space<vmem>>, vector<1x1x8x128xf32>,
    %c0_292 = arith.constant 0 : index
    %c6_293 = arith.constant 6 : index
    %c0_294 = arith.constant 0 : index
    %c0_295 = arith.constant 0 : index
    %303 = vector.load %arg4[%c0_292, %c6_293, %c0_294, %c0_295] : memref<1x8x8x128xf32, #tpu.memory_space<vmem>>, vector<1x1x8x128xf32>
    %304 = vector.shape_cast %303 : vector<1x1x8x128xf32> to vector<8x128xf32>
    %c2_i32_296 = arith.constant 2 : i32
    %305 = vector.broadcast %c2_i32_296 : i32 to vector<8x128xi32>
    %306 = arith.cmpi eq, %223, %305 : vector<8x128xi32>
    %cst_297 = arith.constant 0.000000e+00 : f32
    %307 = vector.broadcast %cst_297 : f32 to vector<8x128xf32>
    %308 = arith.select %306, %296, %307 : vector<8x128xi1>, vector<8x128xf32>
    %309 = arith.addf %304, %308 : vector<8x128xf32>
    %c0_298 = arith.constant 0 : index
    %c6_299 = arith.constant 6 : index
    %c0_300 = arith.constant 0 : index
    %c0_301 = arith.constant 0 : index
    %310 = vector.load %arg4[%c0_298, %c6_299, %c0_300, %c0_301] : memref<1x8x8x128xf32, #tpu.memory_space<vmem>>, vector<1x1x8x128xf32>
    %311 = vector.shape_cast %310 : vector<1x1x8x128xf32> to vector<8x128xf32>
    %312 = vector.shape_cast %309 : vector<8x128xf32> to vector<1x1x8x128xf32>
    tpu.vector_store %arg4[%c0_298, %c6_299, %c0_300, %c0_301], %312 {strides = array<i32>} : memref<1x8x8x128xf32, #tpu.memory_space<vmem>>, vector<1x1x8x128xf32>,
    %313 = arith.mulf %256, %261 : vector<8x128xf32>
    %c0_302 = arith.constant 0 : index
    %c3_303 = arith.constant 3 : index
    %c0_304 = arith.constant 0 : index
    %c0_305 = arith.constant 0 : index
    %314 = vector.load %arg4[%c0_302, %c3_303, %c0_304, %c0_305] : memref<1x8x8x128xf32, #tpu.memory_space<vmem>>, vector<1x1x8x128xf32>
    %315 = vector.shape_cast %314 : vector<1x1x8x128xf32> to vector<8x128xf32>
    %316 = arith.addf %315, %313 : vector<8x128xf32>
    %c0_306 = arith.constant 0 : index
    %c3_307 = arith.constant 3 : index
    %c0_308 = arith.constant 0 : index
    %c0_309 = arith.constant 0 : index
    %317 = vector.load %arg4[%c0_306, %c3_307, %c0_308, %c0_309] : memref<1x8x8x128xf32, #tpu.memory_space<vmem>>, vector<1x1x8x128xf32>
    %318 = vector.shape_cast %317 : vector<1x1x8x128xf32> to vector<8x128xf32>
    %319 = vector.shape_cast %316 : vector<8x128xf32> to vector<1x1x8x128xf32>
    tpu.vector_store %arg4[%c0_306, %c3_307, %c0_308, %c0_309], %319 {strides = array<i32>} : memref<1x8x8x128xf32, #tpu.memory_space<vmem>>, vector<1x1x8x128xf32>,
    %c0_310 = arith.constant 0 : index
    %c7_311 = arith.constant 7 : index
    %c0_312 = arith.constant 0 : index
    %c0_313 = arith.constant 0 : index
    %320 = vector.load %arg4[%c0_310, %c7_311, %c0_312, %c0_313] : memref<1x8x8x128xf32, #tpu.memory_space<vmem>>, vector<1x1x8x128xf32>
    %321 = vector.shape_cast %320 : vector<1x1x8x128xf32> to vector<8x128xf32>
    %c3_i32_314 = arith.constant 3 : i32
    %322 = vector.broadcast %c3_i32_314 : i32 to vector<8x128xi32>
    %323 = arith.cmpi eq, %223, %322 : vector<8x128xi32>
    %cst_315 = arith.constant 0.000000e+00 : f32
    %324 = vector.broadcast %cst_315 : f32 to vector<8x128xf32>
    %325 = arith.select %323, %313, %324 : vector<8x128xi1>, vector<8x128xf32>
    %326 = arith.addf %321, %325 : vector<8x128xf32>
    %c0_316 = arith.constant 0 : index
    %c7_317 = arith.constant 7 : index
    %c0_318 = arith.constant 0 : index
    %c0_319 = arith.constant 0 : index
    %327 = vector.load %arg4[%c0_316, %c7_317, %c0_318, %c0_319] : memref<1x8x8x128xf32, #tpu.memory_space<vmem>>, vector<1x1x8x128xf32>
    %328 = vector.shape_cast %327 : vector<1x1x8x128xf32> to vector<8x128xf32>
    %329 = vector.shape_cast %326 : vector<8x128xf32> to vector<1x1x8x128xf32>
    tpu.vector_store %arg4[%c0_316, %c7_317, %c0_318, %c0_319], %329 {strides = array<i32>} : memref<1x8x8x128xf32, #tpu.memory_space<vmem>>, vector<1x1x8x128xf32>,
    %c0_320 = arith.constant 0 : index
    %c24 = arith.constant 24 : index
    %c0_321 = arith.constant 0 : index
    %330 = vector.load %arg3[%c0_320, %c24, %c0_321] : memref<1x32x128xi8, #tpu.memory_space<vmem>>, vector<1x8x128xi8>
    %331 = vector.shape_cast %330 : vector<1x8x128xi8> to vector<8x128xi8>
    %332 = arith.extsi %331 : vector<8x128xi8> to vector<8x128xi32>
    %c0_i32_322 = arith.constant 0 : i32
    %333 = vector.broadcast %c0_i32_322 : i32 to vector<8x128xi32>
    %334 = arith.cmpi sge, %332, %333 : vector<8x128xi32>
    %c0_323 = arith.constant 0 : index
    %c0_324 = arith.constant 0 : index
    %c24_325 = arith.constant 24 : index
    %c0_326 = arith.constant 0 : index
    %335 = vector.load %arg2[%c0_323, %c0_324, %c24_325, %c0_326] : memref<1x4x32x128xf32, #tpu.memory_space<vmem>>, vector<1x1x8x128xf32>
    %336 = vector.shape_cast %335 : vector<1x1x8x128xf32> to vector<8x128xf32>
    %c0_327 = arith.constant 0 : index
    %c1_328 = arith.constant 1 : index
    %c24_329 = arith.constant 24 : index
    %c0_330 = arith.constant 0 : index
    %337 = vector.load %arg2[%c0_327, %c1_328, %c24_329, %c0_330] : memref<1x4x32x128xf32, #tpu.memory_space<vmem>>, vector<1x1x8x128xf32>
    %338 = vector.shape_cast %337 : vector<1x1x8x128xf32> to vector<8x128xf32>
    %339 = arith.maximumf %336, %338 : vector<8x128xf32>
    %c0_331 = arith.constant 0 : index
    %c2_332 = arith.constant 2 : index
    %c24_333 = arith.constant 24 : index
    %c0_334 = arith.constant 0 : index
    %340 = vector.load %arg2[%c0_331, %c2_332, %c24_333, %c0_334] : memref<1x4x32x128xf32, #tpu.memory_space<vmem>>, vector<1x1x8x128xf32>
    %341 = vector.shape_cast %340 : vector<1x1x8x128xf32> to vector<8x128xf32>
    %342 = arith.maximumf %339, %341 : vector<8x128xf32>
    %c0_335 = arith.constant 0 : index
    %c3_336 = arith.constant 3 : index
    %c24_337 = arith.constant 24 : index
    %c0_338 = arith.constant 0 : index
    %343 = vector.load %arg2[%c0_335, %c3_336, %c24_337, %c0_338] : memref<1x4x32x128xf32, #tpu.memory_space<vmem>>, vector<1x1x8x128xf32>
    %344 = vector.shape_cast %343 : vector<1x1x8x128xf32> to vector<8x128xf32>
    %345 = arith.maximumf %342, %344 : vector<8x128xf32>
    %cst_339 = arith.constant 0.000000e+00 : f32
    %346 = vector.broadcast %cst_339 : f32 to vector<8x128xf32>
    %c0_340 = arith.constant 0 : index
    %c0_341 = arith.constant 0 : index
    %c24_342 = arith.constant 24 : index
    %c0_343 = arith.constant 0 : index
    %347 = vector.load %arg2[%c0_340, %c0_341, %c24_342, %c0_343] : memref<1x4x32x128xf32, #tpu.memory_space<vmem>>, vector<1x1x8x128xf32>
    %348 = vector.shape_cast %347 : vector<1x1x8x128xf32> to vector<8x128xf32>
    %349 = arith.subf %348, %345 : vector<8x128xf32>
    %350 = math.exp %349 : vector<8x128xf32>
    %351 = arith.addf %346, %350 : vector<8x128xf32>
    %c0_344 = arith.constant 0 : index
    %c1_345 = arith.constant 1 : index
    %c24_346 = arith.constant 24 : index
    %c0_347 = arith.constant 0 : index
    %352 = vector.load %arg2[%c0_344, %c1_345, %c24_346, %c0_347] : memref<1x4x32x128xf32, #tpu.memory_space<vmem>>, vector<1x1x8x128xf32>
    %353 = vector.shape_cast %352 : vector<1x1x8x128xf32> to vector<8x128xf32>
    %354 = arith.subf %353, %345 : vector<8x128xf32>
    %355 = math.exp %354 : vector<8x128xf32>
    %356 = arith.addf %351, %355 : vector<8x128xf32>
    %c0_348 = arith.constant 0 : index
    %c2_349 = arith.constant 2 : index
    %c24_350 = arith.constant 24 : index
    %c0_351 = arith.constant 0 : index
    %357 = vector.load %arg2[%c0_348, %c2_349, %c24_350, %c0_351] : memref<1x4x32x128xf32, #tpu.memory_space<vmem>>, vector<1x1x8x128xf32>
    %358 = vector.shape_cast %357 : vector<1x1x8x128xf32> to vector<8x128xf32>
    %359 = arith.subf %358, %345 : vector<8x128xf32>
    %360 = math.exp %359 : vector<8x128xf32>
    %361 = arith.addf %356, %360 : vector<8x128xf32>
    %c0_352 = arith.constant 0 : index
    %c3_353 = arith.constant 3 : index
    %c24_354 = arith.constant 24 : index
    %c0_355 = arith.constant 0 : index
    %362 = vector.load %arg2[%c0_352, %c3_353, %c24_354, %c0_355] : memref<1x4x32x128xf32, #tpu.memory_space<vmem>>, vector<1x1x8x128xf32>
    %363 = vector.shape_cast %362 : vector<1x1x8x128xf32> to vector<8x128xf32>
    %364 = arith.subf %363, %345 : vector<8x128xf32>
    %365 = math.exp %364 : vector<8x128xf32>
    %366 = arith.addf %361, %365 : vector<8x128xf32>
    %cst_356 = arith.constant 1.000000e+00 : f32
    %367 = vector.broadcast %cst_356 : f32 to vector<8x128xf32>
    %368 = arith.divf %367, %366 : vector<8x128xf32>
    %cst_357 = arith.constant 0.000000e+00 : f32
    %369 = vector.broadcast %cst_357 : f32 to vector<8x128xf32>
    %370 = arith.select %334, %368, %369 : vector<8x128xi1>, vector<8x128xf32>
    %371 = arith.mulf %350, %370 : vector<8x128xf32>
    %c0_358 = arith.constant 0 : index
    %c0_359 = arith.constant 0 : index
    %c0_360 = arith.constant 0 : index
    %c0_361 = arith.constant 0 : index
    %372 = vector.load %arg4[%c0_358, %c0_359, %c0_360, %c0_361] : memref<1x8x8x128xf32, #tpu.memory_space<vmem>>, vector<1x1x8x128xf32>
    %373 = vector.shape_cast %372 : vector<1x1x8x128xf32> to vector<8x128xf32>
    %374 = arith.addf %373, %371 : vector<8x128xf32>
    %c0_362 = arith.constant 0 : index
    %c0_363 = arith.constant 0 : index
    %c0_364 = arith.constant 0 : index
    %c0_365 = arith.constant 0 : index
    %375 = vector.load %arg4[%c0_362, %c0_363, %c0_364, %c0_365] : memref<1x8x8x128xf32, #tpu.memory_space<vmem>>, vector<1x1x8x128xf32>
    %376 = vector.shape_cast %375 : vector<1x1x8x128xf32> to vector<8x128xf32>
    %377 = vector.shape_cast %374 : vector<8x128xf32> to vector<1x1x8x128xf32>
    tpu.vector_store %arg4[%c0_362, %c0_363, %c0_364, %c0_365], %377 {strides = array<i32>} : memref<1x8x8x128xf32, #tpu.memory_space<vmem>>, vector<1x1x8x128xf32>,
    %c0_366 = arith.constant 0 : index
    %c4_367 = arith.constant 4 : index
    %c0_368 = arith.constant 0 : index
    %c0_369 = arith.constant 0 : index
    %378 = vector.load %arg4[%c0_366, %c4_367, %c0_368, %c0_369] : memref<1x8x8x128xf32, #tpu.memory_space<vmem>>, vector<1x1x8x128xf32>
    %379 = vector.shape_cast %378 : vector<1x1x8x128xf32> to vector<8x128xf32>
    %c0_i32_370 = arith.constant 0 : i32
    %380 = vector.broadcast %c0_i32_370 : i32 to vector<8x128xi32>
    %381 = arith.cmpi eq, %332, %380 : vector<8x128xi32>
    %cst_371 = arith.constant 0.000000e+00 : f32
    %382 = vector.broadcast %cst_371 : f32 to vector<8x128xf32>
    %383 = arith.select %381, %371, %382 : vector<8x128xi1>, vector<8x128xf32>
    %384 = arith.addf %379, %383 : vector<8x128xf32>
    %c0_372 = arith.constant 0 : index
    %c4_373 = arith.constant 4 : index
    %c0_374 = arith.constant 0 : index
    %c0_375 = arith.constant 0 : index
    %385 = vector.load %arg4[%c0_372, %c4_373, %c0_374, %c0_375] : memref<1x8x8x128xf32, #tpu.memory_space<vmem>>, vector<1x1x8x128xf32>
    %386 = vector.shape_cast %385 : vector<1x1x8x128xf32> to vector<8x128xf32>
    %387 = vector.shape_cast %384 : vector<8x128xf32> to vector<1x1x8x128xf32>
    tpu.vector_store %arg4[%c0_372, %c4_373, %c0_374, %c0_375], %387 {strides = array<i32>} : memref<1x8x8x128xf32, #tpu.memory_space<vmem>>, vector<1x1x8x128xf32>,
    %388 = arith.mulf %355, %370 : vector<8x128xf32>
    %c0_376 = arith.constant 0 : index
    %c1_377 = arith.constant 1 : index
    %c0_378 = arith.constant 0 : index
    %c0_379 = arith.constant 0 : index
    %389 = vector.load %arg4[%c0_376, %c1_377, %c0_378, %c0_379] : memref<1x8x8x128xf32, #tpu.memory_space<vmem>>, vector<1x1x8x128xf32>
    %390 = vector.shape_cast %389 : vector<1x1x8x128xf32> to vector<8x128xf32>
    %391 = arith.addf %390, %388 : vector<8x128xf32>
    %c0_380 = arith.constant 0 : index
    %c1_381 = arith.constant 1 : index
    %c0_382 = arith.constant 0 : index
    %c0_383 = arith.constant 0 : index
    %392 = vector.load %arg4[%c0_380, %c1_381, %c0_382, %c0_383] : memref<1x8x8x128xf32, #tpu.memory_space<vmem>>, vector<1x1x8x128xf32>
    %393 = vector.shape_cast %392 : vector<1x1x8x128xf32> to vector<8x128xf32>
    %394 = vector.shape_cast %391 : vector<8x128xf32> to vector<1x1x8x128xf32>
    tpu.vector_store %arg4[%c0_380, %c1_381, %c0_382, %c0_383], %394 {strides = array<i32>} : memref<1x8x8x128xf32, #tpu.memory_space<vmem>>, vector<1x1x8x128xf32>,
    %c0_384 = arith.constant 0 : index
    %c5_385 = arith.constant 5 : index
    %c0_386 = arith.constant 0 : index
    %c0_387 = arith.constant 0 : index
    %395 = vector.load %arg4[%c0_384, %c5_385, %c0_386, %c0_387] : memref<1x8x8x128xf32, #tpu.memory_space<vmem>>, vector<1x1x8x128xf32>
    %396 = vector.shape_cast %395 : vector<1x1x8x128xf32> to vector<8x128xf32>
    %c1_i32_388 = arith.constant 1 : i32
    %397 = vector.broadcast %c1_i32_388 : i32 to vector<8x128xi32>
    %398 = arith.cmpi eq, %332, %397 : vector<8x128xi32>
    %cst_389 = arith.constant 0.000000e+00 : f32
    %399 = vector.broadcast %cst_389 : f32 to vector<8x128xf32>
    %400 = arith.select %398, %388, %399 : vector<8x128xi1>, vector<8x128xf32>
    %401 = arith.addf %396, %400 : vector<8x128xf32>
    %c0_390 = arith.constant 0 : index
    %c5_391 = arith.constant 5 : index
    %c0_392 = arith.constant 0 : index
    %c0_393 = arith.constant 0 : index
    %402 = vector.load %arg4[%c0_390, %c5_391, %c0_392, %c0_393] : memref<1x8x8x128xf32, #tpu.memory_space<vmem>>, vector<1x1x8x128xf32>
    %403 = vector.shape_cast %402 : vector<1x1x8x128xf32> to vector<8x128xf32>
    %404 = vector.shape_cast %401 : vector<8x128xf32> to vector<1x1x8x128xf32>
    tpu.vector_store %arg4[%c0_390, %c5_391, %c0_392, %c0_393], %404 {strides = array<i32>} : memref<1x8x8x128xf32, #tpu.memory_space<vmem>>, vector<1x1x8x128xf32>,
    %405 = arith.mulf %360, %370 : vector<8x128xf32>
    %c0_394 = arith.constant 0 : index
    %c2_395 = arith.constant 2 : index
    %c0_396 = arith.constant 0 : index
    %c0_397 = arith.constant 0 : index
    %406 = vector.load %arg4[%c0_394, %c2_395, %c0_396, %c0_397] : memref<1x8x8x128xf32, #tpu.memory_space<vmem>>, vector<1x1x8x128xf32>
    %407 = vector.shape_cast %406 : vector<1x1x8x128xf32> to vector<8x128xf32>
    %408 = arith.addf %407, %405 : vector<8x128xf32>
    %c0_398 = arith.constant 0 : index
    %c2_399 = arith.constant 2 : index
    %c0_400 = arith.constant 0 : index
    %c0_401 = arith.constant 0 : index
    %409 = vector.load %arg4[%c0_398, %c2_399, %c0_400, %c0_401] : memref<1x8x8x128xf32, #tpu.memory_space<vmem>>, vector<1x1x8x128xf32>
    %410 = vector.shape_cast %409 : vector<1x1x8x128xf32> to vector<8x128xf32>
    %411 = vector.shape_cast %408 : vector<8x128xf32> to vector<1x1x8x128xf32>
    tpu.vector_store %arg4[%c0_398, %c2_399, %c0_400, %c0_401], %411 {strides = array<i32>} : memref<1x8x8x128xf32, #tpu.memory_space<vmem>>, vector<1x1x8x128xf32>,
    %c0_402 = arith.constant 0 : index
    %c6_403 = arith.constant 6 : index
    %c0_404 = arith.constant 0 : index
    %c0_405 = arith.constant 0 : index
    %412 = vector.load %arg4[%c0_402, %c6_403, %c0_404, %c0_405] : memref<1x8x8x128xf32, #tpu.memory_space<vmem>>, vector<1x1x8x128xf32>
    %413 = vector.shape_cast %412 : vector<1x1x8x128xf32> to vector<8x128xf32>
    %c2_i32_406 = arith.constant 2 : i32
    %414 = vector.broadcast %c2_i32_406 : i32 to vector<8x128xi32>
    %415 = arith.cmpi eq, %332, %414 : vector<8x128xi32>
    %cst_407 = arith.constant 0.000000e+00 : f32
    %416 = vector.broadcast %cst_407 : f32 to vector<8x128xf32>
    %417 = arith.select %415, %405, %416 : vector<8x128xi1>, vector<8x128xf32>
    %418 = arith.addf %413, %417 : vector<8x128xf32>
    %c0_408 = arith.constant 0 : index
    %c6_409 = arith.constant 6 : index
    %c0_410 = arith.constant 0 : index
    %c0_411 = arith.constant 0 : index
    %419 = vector.load %arg4[%c0_408, %c6_409, %c0_410, %c0_411] : memref<1x8x8x128xf32, #tpu.memory_space<vmem>>, vector<1x1x8x128xf32>
    %420 = vector.shape_cast %419 : vector<1x1x8x128xf32> to vector<8x128xf32>
    %421 = vector.shape_cast %418 : vector<8x128xf32> to vector<1x1x8x128xf32>
    tpu.vector_store %arg4[%c0_408, %c6_409, %c0_410, %c0_411], %421 {strides = array<i32>} : memref<1x8x8x128xf32, #tpu.memory_space<vmem>>, vector<1x1x8x128xf32>,
    %422 = arith.mulf %365, %370 : vector<8x128xf32>
    %c0_412 = arith.constant 0 : index
    %c3_413 = arith.constant 3 : index
    %c0_414 = arith.constant 0 : index
    %c0_415 = arith.constant 0 : index
    %423 = vector.load %arg4[%c0_412, %c3_413, %c0_414, %c0_415] : memref<1x8x8x128xf32, #tpu.memory_space<vmem>>, vector<1x1x8x128xf32>
    %424 = vector.shape_cast %423 : vector<1x1x8x128xf32> to vector<8x128xf32>
    %425 = arith.addf %424, %422 : vector<8x128xf32>
    %c0_416 = arith.constant 0 : index
    %c3_417 = arith.constant 3 : index
    %c0_418 = arith.constant 0 : index
    %c0_419 = arith.constant 0 : index
    %426 = vector.load %arg4[%c0_416, %c3_417, %c0_418, %c0_419] : memref<1x8x8x128xf32, #tpu.memory_space<vmem>>, vector<1x1x8x128xf32>
    %427 = vector.shape_cast %426 : vector<1x1x8x128xf32> to vector<8x128xf32>
    %428 = vector.shape_cast %425 : vector<8x128xf32> to vector<1x1x8x128xf32>
    tpu.vector_store %arg4[%c0_416, %c3_417, %c0_418, %c0_419], %428 {strides = array<i32>} : memref<1x8x8x128xf32, #tpu.memory_space<vmem>>, vector<1x1x8x128xf32>,
    %c0_420 = arith.constant 0 : index
    %c7_421 = arith.constant 7 : index
    %c0_422 = arith.constant 0 : index
    %c0_423 = arith.constant 0 : index
    %429 = vector.load %arg4[%c0_420, %c7_421, %c0_422, %c0_423] : memref<1x8x8x128xf32, #tpu.memory_space<vmem>>, vector<1x1x8x128xf32>
    %430 = vector.shape_cast %429 : vector<1x1x8x128xf32> to vector<8x128xf32>
    %c3_i32_424 = arith.constant 3 : i32
    %431 = vector.broadcast %c3_i32_424 : i32 to vector<8x128xi32>
    %432 = arith.cmpi eq, %332, %431 : vector<8x128xi32>
    %cst_425 = arith.constant 0.000000e+00 : f32
    %433 = vector.broadcast %cst_425 : f32 to vector<8x128xf32>
    %434 = arith.select %432, %422, %433 : vector<8x128xi1>, vector<8x128xf32>
    %435 = arith.addf %430, %434 : vector<8x128xf32>
    %c0_426 = arith.constant 0 : index
    %c7_427 = arith.constant 7 : index
    %c0_428 = arith.constant 0 : index
    %c0_429 = arith.constant 0 : index
    %436 = vector.load %arg4[%c0_426, %c7_427, %c0_428, %c0_429] : memref<1x8x8x128xf32, #tpu.memory_space<vmem>>, vector<1x1x8x128xf32>
    %437 = vector.shape_cast %436 : vector<1x1x8x128xf32> to vector<8x128xf32>
    %438 = vector.shape_cast %435 : vector<8x128xf32> to vector<1x1x8x128xf32>
    tpu.vector_store %arg4[%c0_426, %c7_427, %c0_428, %c0_429], %438 {strides = array<i32>} : memref<1x8x8x128xf32, #tpu.memory_space<vmem>>, vector<1x1x8x128xf32>,
    return
  }
  func.func @transform_0(%arg0: i32, %arg1: i32) -> (i32, i32, i32, i32) {
    %c0_i32 = arith.constant 0 : i32
    %c0_i32_0 = arith.constant 0 : i32
    %c0_i32_1 = arith.constant 0 : i32
    return %arg0, %c0_i32, %arg1, %c0_i32_0 : i32, i32, i32, i32
  }
  func.func @transform_1(%arg0: i32, %arg1: i32) -> (i32, i32, i32) {
    %c0_i32 = arith.constant 0 : i32
    %c0_i32_0 = arith.constant 0 : i32
    return %arg0, %arg1, %c0_i32 : i32, i32, i32
  }
  func.func @transform_2(%arg0: i32, %arg1: i32) -> (i32, i32, i32, i32) {
    %c0_i32 = arith.constant 0 : i32
    %c0_i32_0 = arith.constant 0 : i32
    %c0_i32_1 = arith.constant 0 : i32
    %c0_i32_2 = arith.constant 0 : i32
    return %arg0, %c0_i32, %c0_i32_0, %c0_i32_1 : i32, i32, i32, i32
  }
}

</mosaic_0001>

<bundles_post_ra>
// kernel: soft_dice_loss.1
= control target key start
LH: loop header
LB: loop body
LE: loop exit
PB: predicated region body
PF: predicated region fallthrough
CT: control target
= control target key end

     0   :  { %s755_s9 = smov 0   ;;  %s757_s10 = smov 0   ;;  %s902_s0 = inlined_call_operand.vmem [shape: f32[2,4,32,128], index: 0, kind: input, shape index: {}]   ;;  %s903_s1 = inlined_call_operand.vmem [shape: s8[2,32,128], index: 1, kind: input, shape index: {}]   ;;  %s904_s2 = inlined_call_operand.vmem [shape: f32[2,8,8,128], index: 2, kind: output, shape index: {}]  }
   0x1   :  { %s759_s11 = smov 0  }
   0x2 LB: > { %s24_s12 = sadd.s32 1, %s734_s10  ;;  %p573_p0 = scmp.ge.s32.totalorder %s738_s11, 1  ;;  %s738_s11 = sphi %s759_s11, %s12_s11   ;;  %s734_s10 = sphi %s757_s10, %s906_s10   ;;  %s730_s9 = sphi %s755_s9, %s905_s9  }
   0x3   : > { %p26_p1 = scmp.ge.s32.totalorder %s24_s12, 2  ;;  %p145_p2 = scmp.lt.s32.totalorder %s738_s11, 3 }
   0x5   : > { %s908_s12 = smov (%p26_p1, %s24_s12), 0  ;;  %p146_p3 = pnand %p573_p0, %p145_p2 }
   0x6   : > { %p179_p4 = scmp.lt.s32.totalorder (!%p146_p3), %s730_s9, 1 }
   0x7   : > { %149 = sbr.rel (%p146_p3) target bundleno = 85 (0x55), region = 28 }
   0xe   : > { %s910_s9 = smov (!%p179_p4, %s730_s9), 1 }
   0xf   : > { %s649_s13 = sshll.u32 %s910_s9, 7  ;;  %s576_s17 = sshll.u32 %s910_s9, 3 }
  0x10   : > { %s779_s16 = scalar_lea.vmem %s902_s0, %s649_s13  ;;  %s823_s20 = scalar_lea.vmem %s903_s1, %s576_s17 }
  0x11   : > { %v215_v0 = vld [vmem:[%s779_s16] sm:$0xff]  ;;  %v291_v4 = vld [vmem:[%s779_s16 + $0x8] sm:$0xff]  ;;  %v357_v26 = vld [vmem:[%s779_s16 + $0x10] sm:$0xff]  ;;  %s650_s21 = sshll.u32 %s910_s9, 6 }
  0x12   : > { %v579_v1 = vld [vmem:[%s779_s16 + $0x20] sm:$0xff]  ;;  %v596_v5 = vld [vmem:[%s779_s16 + $0x28] sm:$0xff]  ;;  %v613_v27 = vld [vmem:[%s779_s16 + $0x30] sm:$0xff]  ;;  %s199_s24 = scalar_lea.vmem %s904_s2, %s650_s21 }
  0x13   : > { %v580_v2 = vld [vmem:[%s779_s16 + $0x40] sm:$0xff]  ;;  %v218_v3 = vmax.f32 %v215_v0, %v579_v1  ;;  %v293_v7 = vmax.f32 %v291_v4, %v596_v5  ;;  %v597_v8 = vld [vmem:[%s779_s16 + $0x48] sm:$0xff]  ;;  %v614_v30 = vld [vmem:[%s779_s16 + $0x50] sm:$0xff]  ;;  %v359_v34 = vmax.f32 %v357_v26, %v613_v27 }
  0x14   : > { %v581_v6 = vld [vmem:[%s779_s16 + $0x60] sm:$0xff]  ;;  %v598_v10 = vld [vmem:[%s779_s16 + $0x68] sm:$0xff]  ;;  %v423_v31 = vld [vmem:[%s779_s16 + $0x18] sm:$0xff] }
  0x15   : > { %v221_v9 = vmax.f32 %v218_v3, %v580_v2  ;;  %v295_v11 = vmax.f32 %v293_v7, %v597_v8  ;;  %v630_v32 = vld [vmem:[%s779_s16 + $0x38] sm:$0xff]  ;;  %v615_v36 = vld [vmem:[%s779_s16 + $0x70] sm:$0xff]  ;;  %v361_v38 = vmax.f32 %v359_v34, %v614_v30 }
  0x16   : > { %v631_v37 = vld [vmem:[%s779_s16 + $0x58] sm:$0xff]  ;;  %v425_v39 = vmax.f32 %v423_v31, %v630_v32 }
  0x17   : > { %v224_v12 = vmax.f32 %v221_v9, %v581_v6  ;;  %v297_v13 = vmax.f32 %v295_v11, %v598_v10  ;;  %v363_v40 = vmax.f32 %v361_v38, %v615_v36  ;;  %v632_v42 = vld [vmem:[%s779_s16 + $0x78] sm:$0xff]  ;;  %v212_v9 = vld [vmem:[%s823_s20] sm:$0x3] }
  0x18   : > { %v427_v41 = vmax.f32 %v425_v39, %v631_v37 }
  0x19   : > { %v225_v14 = vsub.f32 %v215_v0, %v224_v12  ;;  %v229_v15 = vsub.f32 %v579_v1, %v224_v12  ;;  %v233_v16 = vsub.f32 %v580_v2, %v224_v12  ;;  %v237_v17 = vsub.f32 %v581_v6, %v224_v12 }
  0x1a   : > { %v298_v18 = vsub.f32 %v291_v4, %v297_v13  ;;  %v302_v19 = vsub.f32 %v596_v5, %v297_v13  ;;  %v306_v23 = vsub.f32 %v597_v8, %v297_v13  ;;  %v310_v25 = vsub.f32 %v598_v10, %v297_v13  ;;  %v287_v10 = vld [vmem:[%s823_s20] sm:$0xc] }
  0x1b   : > { %v226_v20 = vmul.f32 1.442695, %v225_v14  ;;  %v230_v21 = vmul.f32 1.442695, %v229_v15  ;;  %v234_v22 = vmul.f32 1.442695, %v233_v16  ;;  %v364_v43 = vsub.f32 %v357_v26, %v363_v40 }
  0x1c   : > { %v238_v24 = vmul.f32 1.442695, %v237_v17  ;;  %v299_v28 = vmul.f32 1.442695, %v298_v18  ;;  %v303_v29 = vmul.f32 1.442695, %v302_v19  ;;  %v368_v44 = vsub.f32 %v613_v27, %v363_v40 }
  0x1d   : > { %676 = vpow2.f32 %v226_v20  ;;  %v307_v33 = vmul.f32 1.442695, %v306_v23  ;;  %v311_v35 = vmul.f32 1.442695, %v310_v25  ;;  %v372_v45 = vsub.f32 %v614_v30, %v363_v40  ;;  %v353_v19 = vld [vmem:[%s823_s20] sm:$0x30] }
  0x1e   : > { %678 = vpow2.f32 %v230_v21  ;;  %v376_v46 = vsub.f32 %v615_v36, %v363_v40  ;;  %v429_v47 = vmax.f32 %v427_v41, %v632_v42  ;;  %v365_v49 = vmul.f32 1.442695, %v364_v43 }
  0x1f   : > { %680 = vpow2.f32 %v234_v22  ;;  %v369_v50 = vmul.f32 1.442695, %v368_v44  ;;  %v373_v51 = vmul.f32 1.442695, %v372_v45  ;;  %v213_v14 = vunpack.c.0.s8 %v212_v9 }
  0x20   : > { %682 = vpow2.f32 %v238_v24  ;;  %v377_v53 = vmul.f32 1.442695, %v376_v46  ;;  %v430_v54 = vsub.f32 %v423_v31, %v429_v47  ;;  %v434_v55 = vsub.f32 %v630_v32, %v429_v47  ;;  %v419_v32 = vld [vmem:[%s823_s20] sm:$0xc0] }
  0x21   : > { %684 = vpow2.f32 %v299_v28  ;;  %v438_v56 = vsub.f32 %v631_v37, %v429_v47  ;;  %v442_v2 = vsub.f32 %v632_v42, %v429_v47  ;;  %v288_v15 = vrot.slane %v287_v10, 2 }
  0x22   : > { %686 = vpow2.f32 %v303_v29  ;;  %v431_v60 = vmul.f32 1.442695, %v430_v54  ;;  %v435_v61 = vmul.f32 1.442695, %v434_v55  ;;  %vm214_vm0 = vcmp.ge.s32.totalorder %v213_v14, 0 }
  0x23   : > { %688 = vpow2.f32 %v307_v33  ;;  %v439_v1 = vmul.f32 1.442695, %v438_v56  ;;  %v443_v8 = vmul.f32 1.442695, %v442_v2  ;;  %v289_v23 = vunpack.c.0.s8 %v288_v15 }
  0x24   : > { %690 = vpow2.f32 %v311_v35  ;;  %v354_v25 = vrot.slane %v353_v19, 4  ;;  %vm250_vm2 = vcmp.eq.s32.totalorder %v213_v14, 0  ;;  %vm261_vm3 = vcmp.eq.s32.totalorder %v213_v14, 1 }
  0x25   : > { %692 = vpow2.f32 %v365_v49  ;;  %vm290_vm1 = vcmp.ge.s32.totalorder %v289_v23, 0  ;;  %vm272_vm4 = vcmp.eq.s32.totalorder %v213_v14, 2  ;;  %vm283_vm5 = vcmp.eq.s32.totalorder %v213_v14, 3 }
  0x26   : > { %694 = vpow2.f32 %v369_v50  ;;  %v844_v31 = vunpack.c.0.s8 %v354_v25  ;;  %vm322_vm6 = vcmp.eq.s32.totalorder %v289_v23, 0  ;;  %vm331_vm7 = vcmp.eq.s32.totalorder %v289_v23, 1 }
  0x27   : > { %v797_v48 = vpop.eup %676  ;;  %696 = vpow2.f32 %v373_v51  ;;  %vm340_vm8 = vcmp.eq.s32.totalorder %v289_v23, 2  ;;  %v420_v39 = vrot.slane %v419_v32, 6  ;;  %vm349_vm9 = vcmp.eq.s32.totalorder %v289_v23, 3 }
  0x28   : > { %v799_v52 = vpop.eup %678  ;;  %698 = vpow2.f32 %v377_v53  ;;  %vm356_vm10 = vcmp.ge.s32.totalorder %v844_v31, 0  ;;  %vm388_vm11 = vcmp.eq.s32.totalorder %v844_v31, 0  ;;  %vm397_vm12 = vcmp.eq.s32.totalorder %v844_v31, 1 }
  0x29   : > { %v801_v57 = vpop.eup %680  ;;  %v232_v58 = vadd.f32 %v799_v52, %v797_v48  ;;  %700 = vpow2.f32 %v431_v60  ;;  %vm406_vm13 = vcmp.eq.s32.totalorder %v844_v31, 2  ;;  %vm415_vm14 = vcmp.eq.s32.totalorder %v844_v31, 3 }
  0x2a   : > { %v805_v59 = vpop.eup %682  ;;  %702 = vpow2.f32 %v435_v61 }
  0x2b   : > { %v807_v62 = vpop.eup %684  ;;  %v236_v63 = vadd.f32 %v801_v57, %v232_v58 }
  0x2c   : > { %v811_v0 = vpop.eup %686 }
  0x2d   : > { %v813_v3 = vpop.eup %688  ;;  %v240_v4 = vadd.f32 %v805_v59, %v236_v63  ;;  %v305_v5 = vadd.f32 %v811_v0, %v807_v62 }
  0x2e   : > { %v818_v6 = vpop.eup %690 }
  0x2f   : > { %704 = vrcp.f32 %v240_v4  ;;  %v309_v7 = vadd.f32 %v813_v3, %v305_v5  ;;  %v829_v12 = vpop.eup %692 }
  0x30   : > { %706 = vpow2.f32 %v439_v1  ;;  %v695_v13 = vpop.eup %694 }
  0x31   : > { %v313_v11 = vadd.f32 %v818_v6, %v309_v7  ;;  %v697_v16 = vpop.eup %696  ;;  %v371_v17 = vadd.f32 %v695_v13, %v829_v12 }
  0x32   : > { %v832_v18 = vpop.eup %698 }
  0x33   : > { %708 = vrcp.f32 %v313_v11  ;;  %v835_v20 = vpop.eup %700  ;;  %v375_v21 = vadd.f32 %v697_v16, %v371_v17 }
  0x34   : > { %710 = vpow2.f32 %v443_v8  ;;  %v837_v22 = vpop.eup %702 }
  0x35   : > { %v379_v26 = vadd.f32 %v832_v18, %v375_v21  ;;  %v437_v27 = vadd.f32 %v837_v22, %v835_v20 }
  0x37   : > { %712 = vrcp.f32 %v379_v26 }
  0x39   : > { %v705_v24 = vpop.eup %704 }
  0x3a   : > { %v842_v28 = vpop.eup %706  ;;  %v243_v29 = vsel %vm214_vm0, %v705_v24, 0.0 }
  0x3b   : > { %v441_v33 = vadd.f32 %v842_v28, %v437_v27  ;;  %v244_v35 = vmul.f32 %v797_v48, %v243_v29  ;;  %v254_v36 = vmul.f32 %v799_v52, %v243_v29  ;;  %v265_v38 = vmul.f32 %v801_v57, %v243_v29 }
  0x3c   : > { %v276_v43 = vmul.f32 %v805_v59, %v243_v29  ;;  %v421_v48 = vunpack.c.0.s8 %v420_v39 }
  0x3d   : > { %v709_v30 = vpop.eup %708  ;;  %v251_v41 = vsel %vm250_vm2, %v244_v35, 0.0  ;;  %v262_v42 = vsel %vm261_vm3, %v254_v36, 0.0  ;;  %v273_v46 = vsel %vm272_vm4, %v265_v38, 0.0 }
  0x3e   : > { %v848_v34 = vpop.eup %710  ;;  %v316_v37 = vsel %vm290_vm1, %v709_v30, 0.0  ;;  %v284_v50 = vsel %vm283_vm5, %v276_v43, 0.0  ;;  %vm422_vm15 = vcmp.ge.s32.totalorder %v421_v48, 0  ;;  %vm454_vm0 = vcmp.eq.s32.totalorder %v421_v48, 0 }
  0x3f   : > { %v445_v40 = vadd.f32 %v848_v34, %v441_v33  ;;  %v317_v44 = vmul.f32 %v807_v62, %v316_v37  ;;  %v326_v45 = vmul.f32 %v811_v0, %v316_v37  ;;  %v335_v47 = vmul.f32 %v813_v3, %v316_v37 }
  0x40   : > { %v344_v52 = vmul.f32 %v818_v6, %v316_v37  ;;  %vm463_vm1 = vcmp.eq.s32.totalorder %v421_v48, 1  ;;  %vm472_vm2 = vcmp.eq.s32.totalorder %v421_v48, 2  ;;  %vm481_vm3 = vcmp.eq.s32.totalorder %v421_v48, 3 }
  0x41   : > { %714 = vrcp.f32 %v445_v40  ;;  %v713_v49 = vpop.eup %712  ;;  %v323_v51 = vsel %vm322_vm6, %v317_v44, 0.0  ;;  %v332_v53 = vsel %vm331_vm7, %v326_v45, 0.0  ;;  %v341_v55 = vsel %vm340_vm8, %v335_v47, 0.0 }
  0x42   : > { %v382_v54 = vsel %vm356_vm10, %v713_v49, 0.0  ;;  %v319_v59 = vadd.f32 %v317_v44, %v244_v35  ;;  %v324_v60 = vadd.f32 %v323_v51, %v251_v41  ;;  %v328_v61 = vadd.f32 %v326_v45, %v254_v36 }
  0x43   : > { %v383_v56 = vmul.f32 %v829_v12, %v382_v54  ;;  %v392_v57 = vmul.f32 %v695_v13, %v382_v54  ;;  %v401_v58 = vmul.f32 %v697_v16, %v382_v54  ;;  %v333_v62 = vadd.f32 %v332_v53, %v262_v42 }
  0x44   : > { %v337_v63 = vadd.f32 %v335_v47, %v265_v38  ;;  %v350_v0 = vsel %vm349_vm9, %v344_v52, 0.0  ;;  %v410_v1 = vmul.f32 %v832_v18, %v382_v54  ;;  %v342_v2 = vadd.f32 %v341_v55, %v273_v46 }
  0x45   : > { %v346_v3 = vadd.f32 %v344_v52, %v276_v43  ;;  %v389_v4 = vsel %vm388_vm11, %v383_v56, 0.0  ;;  %v398_v5 = vsel %vm397_vm12, %v392_v57, 0.0  ;;  %v407_v6 = vsel %vm406_vm13, %v401_v58, 0.0 }
  0x46   : > { %v351_v7 = vadd.f32 %v350_v0, %v284_v50  ;;  %v385_v8 = vadd.f32 %v383_v56, %v319_v59  ;;  %v390_v10 = vadd.f32 %v389_v4, %v324_v60  ;;  %v394_v11 = vadd.f32 %v392_v57, %v328_v61 }
  0x47   : > { %v399_v12 = vadd.f32 %v398_v5, %v333_v62  ;;  %v416_v13 = vsel %vm415_vm14, %v410_v1, 0.0  ;;  %v403_v14 = vadd.f32 %v401_v58, %v337_v63  ;;  %v408_v15 = vadd.f32 %v407_v6, %v342_v2 }
  0x48   : > { %v412_v16 = vadd.f32 %v410_v1, %v346_v3  ;;  %v417_v24 = vadd.f32 %v416_v13, %v351_v7 }
  0x4b   : > { %v715_v9 = vpop.eup %714 }
  0x4c   : > { %v448_v17 = vsel %vm422_vm15, %v715_v9, 0.0 }
  0x4d   : > { %v449_v18 = vmul.f32 %v835_v20, %v448_v17  ;;  %v458_v19 = vmul.f32 %v837_v22, %v448_v17  ;;  %v467_v21 = vmul.f32 %v842_v28, %v448_v17  ;;  %v476_v23 = vmul.f32 %v848_v34, %v448_v17 }
  0x4f   : > { %v451_v25 = vadd.f32 %v449_v18, %v385_v8  ;;  %v455_v26 = vsel %vm454_vm0, %v449_v18, 0.0  ;;  %v460_v27 = vadd.f32 %v458_v19, %v394_v11  ;;  %v464_v29 = vsel %vm463_vm1, %v458_v19, 0.0 }
  0x50   : > { %v456_v30 = vadd.f32 %v455_v26, %v390_v10  ;;  %v465_v20 = vadd.f32 %v464_v29, %v399_v12  ;;  %v469_v31 = vadd.f32 %v467_v21, %v403_v14  ;;  %v473_v22 = vsel %vm472_vm2, %v467_v21, 0.0 }
  0x51   : > { %452 = vst [vmem:[%s199_s24] sm:$0xff] %v451_v25  ;;  %636 = vst [vmem:[%s199_s24 + $0x8] sm:$0xff] %v460_v27  ;;  %v474_v28 = vadd.f32 %v473_v22, %v408_v15  ;;  %v478_v32 = vadd.f32 %v476_v23, %v412_v16  ;;  %v482_v33 = vsel %vm481_vm3, %v476_v23, 0.0 }
  0x52   : > { %634 = vst [vmem:[%s199_s24 + $0x20] sm:$0xff] %v456_v30  ;;  %638 = vst [vmem:[%s199_s24 + $0x28] sm:$0xff] %v465_v20  ;;  %v483_v34 = vadd.f32 %v482_v33, %v417_v24 }
  0x53   : > { %640 = vst [vmem:[%s199_s24 + $0x10] sm:$0xff] %v469_v31  ;;  %642 = vst [vmem:[%s199_s24 + $0x30] sm:$0xff] %v474_v28 }
  0x54   : > { %644 = vst [vmem:[%s199_s24 + $0x18] sm:$0xff] %v478_v32  ;;  %646 = vst [vmem:[%s199_s24 + $0x38] sm:$0xff] %v483_v34 }
  0x55 PF: > { %s12_s11 = sadd.s32 1, %s738_s11   ;;  %s905_s9 = smov %s734_s10 }
  0x56   : > { %p9_p5 = scmp.ge.s32.totalorder %s12_s11, 4   ;;  %s906_s10 = smov %s908_s12 }
  0x58   :  { %11 = sbr.rel (!%p9_p5) target bundleno = 2 (0x2), region = 75 }

</bundles_post_ra>
